<compile_context>
chip_gen: v5e
topology: v5e:2x2
jax: 0.10.0
libtpu: 0.0.40
codegen_flags: <defaults>
</compile_context>

<pallas_src>
import functools
import math

import jax
import jax.numpy as jnp
from jax import lax
from jax.experimental import pallas as pl
from jax.experimental.pallas import tpu as pltpu


# ----------------------------- config ----------------------------------------

@functools.lru_cache(maxsize=1)
def _tpu_defaults():
    gen = None
    try:
        kind = jax.devices()[0].device_kind.lower()
        for tag in ("v7", "v6", "v5"):
            if tag in kind:
                gen = tag
                break
    except Exception:
        pass
    if gen == "v7":      # 64 MiB physical VMEM, 2 TCs
        return dict(vmem_limit=48 * 1024 * 1024, tq_full=256, tq_cap=128,
                    exp_bf16=True)
    if gen == "v6":      # 128 MiB VMEM, bf16 EUP/VPU
        return dict(vmem_limit=96 * 1024 * 1024, tq_full=512, tq_cap=512,
                    exp_bf16=True)
    if gen == "v5":      # 128 MiB VMEM, no bf16 EUP/VPU, writeback-bound
        return dict(vmem_limit=96 * 1024 * 1024, tq_full=512, tq_cap=512,
                    exp_bf16=False)
    return dict(vmem_limit=32 * 1024 * 1024, tq_full=256, tq_cap=256,
                exp_bf16=False)


# ----------------------------- kernel -----------------------------------------

def _layernorm(x, g, b, eps=1e-5):
    mu = jnp.mean(x, axis=-1, keepdims=True)
    var = jnp.mean((x - mu) ** 2, axis=-1, keepdims=True)
    return (x - mu) * lax.rsqrt(var + eps) * g + b


def _encoder_layer_kernel(hid_dim, n_heads, head_dim, fuse_embed, embed_scale,
                          single_tile, return_attention, exp_bf16, *refs):
    refs = list(refs)
    xq_ref = None if single_tile else refs.pop(0)
    xf_ref = refs.pop(0)
    mask_ref = refs.pop(0)
    posq_ref = posf_ref = None
    if fuse_embed:
        if not single_tile:
            posq_ref = refs.pop(0)
        posf_ref = refs.pop(0)
    (wqkv_ref, bqkv_ref, wo_ref, bo_ref, g1_ref, be1_ref,
     w1_ref, b1_ref, w2_ref, b2_ref, g2_ref, be2_ref) = refs[:12]
    refs = refs[12:]
    out_ref = refs.pop(0)
    attn_ref = refs.pop(0) if return_attention else None
    kv_ref = None if single_tile else refs.pop(0)
    ctx_ref = refs.pop(0)

    H = hid_dim

    if single_tile:
        # Q/K/V all from the (single) full-sequence block: one fused MXU matmul.
        x = xf_ref[0].astype(jnp.float32)
        if fuse_embed:                      # src*sqrt(H) + pos_embedding
            x = x * embed_scale + posf_ref[...]
        xq = x                              # residual input (query rows == all rows)
        qkv = jnp.dot(x.astype(jnp.bfloat16), wqkv_ref[...],
                      preferred_element_type=jnp.float32) + bqkv_ref[...]
        q = qkv[:, :H]
        kb = qkv[:, H:2 * H].astype(jnp.bfloat16)
        vb = qkv[:, 2 * H:].astype(jnp.bfloat16)
    else:
        xq = xq_ref[0].astype(jnp.float32)
        if fuse_embed:
            xq = xq * embed_scale + posq_ref[...]

        # K/V are computed once per batch element (t == 0) and cached in VMEM,
        # instead of being recomputed for every query tile.
        @pl.when(pl.program_id(1) == 0)
        def _():
            xf = xf_ref[0].astype(jnp.float32)
            if fuse_embed:
                xf = xf * embed_scale + posf_ref[...]
            kv = jnp.dot(xf.astype(jnp.bfloat16), wqkv_ref[:, H:],
                         preferred_element_type=jnp.float32) + bqkv_ref[:, H:]
            kv_ref[...] = kv.astype(jnp.bfloat16)

        q = jnp.dot(xq.astype(jnp.bfloat16), wqkv_ref[:, :H],
                    preferred_element_type=jnp.float32) + bqkv_ref[:, :H]
        kb = kv_ref[:, :H]
        vb = kv_ref[:, H:]

    # fold 1/sqrt(head_dim) into q once instead of dividing each score tile
    q = q * jnp.float32(1.0 / math.sqrt(head_dim))
    neg_mask = mask_ref[0] == 0.0           # (1, S) bool, computed once

    qb = q.astype(jnp.bfloat16)
    dnums = (((1,), (1,)), ((), ()))        # contract last dims: q @ k^T, no .T

    for h in range(n_heads):                # static unroll keeps MXU/VPU/EUP overlapped
        sl = slice(h * head_dim, (h + 1) * head_dim)
        e = lax.dot_general(qb[:, sl], kb[:, sl], dnums,
                            preferred_element_type=jnp.float32)     # (tq, S) f32
        e = jnp.where(neg_mask, jnp.float32(-1e10), e)               # masked_fill
        m = jnp.max(e, axis=-1, keepdims=True)
        if exp_bf16:                         # v6e/v7x: bf16 EUP, f32 accumulation
            p = jnp.exp((e - m).astype(jnp.bfloat16))
            denom = jnp.sum(p.astype(jnp.float32), axis=-1, keepdims=True)
        else:
            p = jnp.exp(e - m)
            denom = jnp.sum(p, axis=-1, keepdims=True)
        # NOTE: approx reciprocal => attention rows are not bit-exact vs torch.
        a = p.astype(jnp.float32) * pl.reciprocal(denom, approx=True)
        if return_attention:
            attn_ref[0, h] = a.astype(attn_ref.dtype)
        # per-head context written straight into the bf16 VMEM slab (no concat)
        ctx_ref[:, sl] = jnp.dot(a.astype(jnp.bfloat16), vb[:, sl],
                                 preferred_element_type=jnp.float32
                                 ).astype(jnp.bfloat16)

    attn_out = jnp.dot(ctx_ref[...], wo_ref[...],
                       preferred_element_type=jnp.float32) + bo_ref[...]

    # residual + LayerNorm (f32)
    x1 = _layernorm(xq + attn_out, g1_ref[...], be1_ref[...])

    # position-wise feed-forward (bf16 matmul inputs, f32 accumulation)
    f = jnp.dot(x1.astype(jnp.bfloat16), w1_ref[...],
                preferred_element_type=jnp.float32) + b1_ref[...]
    f = jnp.maximum(f, 0.0)
    f = jnp.dot(f.astype(jnp.bfloat16), w2_ref[...],
                preferred_element_type=jnp.float32) + b2_ref[...]

    out_ref[0] = _layernorm(x1 + f, g2_ref[...], be2_ref[...]).astype(out_ref.dtype)


# ----------------------------- wrappers ----------------------------------------

def encoder_layer(src, mask_b1s, layer_params, n_heads, *, pos_emb=None,
                  embed_scale=1.0, attn_dtype=jnp.bfloat16, out_dtype=jnp.float32,
                  return_attention=True, tq=None):
    B, S, H = src.shape
    head_dim = H // n_heads
    pf = layer_params["w1"].shape[1]
    fuse_embed = pos_emb is not None
    cfg = _tpu_defaults()

    # query-tile size: keep the whole sequence when short; per-generation cap otherwise
    if tq is None:
        tq = S if S <= cfg["tq_full"] else cfg["tq_cap"]
    if S % tq:
        tq = S
    n_q = S // tq
    single_tile = n_q == 1
    # TODO(synk): for very long S, switch the KV side to a flash-style tile loop
    #             with running max/sum, and pad H/S to multiples of 128 so
    #             out/attn stores stay lane-dense on realistic shapes.

    def run(single_buffer_weights):
        def const_spec(shape):
            n = len(shape)
            idx = lambda b, t, _n=n: (0,) * _n
            if single_buffer_weights:
                # weights never change across the grid -> no double buffering
                return pl.BlockSpec(shape, idx, pipeline_mode=pl.Buffered(1))
            return pl.BlockSpec(shape, idx)

        in_specs, inputs = [], []
        if not single_tile:
            in_specs.append(pl.BlockSpec((1, tq, H), lambda b, t: (b, t, 0)))
            inputs.append(src)                                  # query tile
        in_specs.append(pl.BlockSpec((1, S, H), lambda b, t: (b, 0, 0)))
        inputs.append(src)                                      # full seq (K/V)
        in_specs.append(pl.BlockSpec((1, 1, S), lambda b, t: (b, 0, 0)))
        inputs.append(mask_b1s)                                 # mask
        if fuse_embed:
            if not single_tile:
                in_specs.append(pl.BlockSpec((tq, H), lambda b, t: (t, 0)))
                inputs.append(pos_emb)                          # pos (query tile)
            in_specs.append(pl.BlockSpec((S, H), lambda b, t: (0, 0)))
            inputs.append(pos_emb)                              # pos (full seq)
        in_specs += [const_spec((H, 3 * H)), const_spec((1, 3 * H)),   # Wq|Wk|Wv
                     const_spec((H, H)), const_spec((1, H)),           # Wo, bo
                     const_spec((1, H)), const_spec((1, H)),           # ln1
                     const_spec((H, pf)), const_spec((1, pf)),         # fc_1
                     const_spec((pf, H)), const_spec((1, H)),          # fc_2
                     const_spec((1, H)), const_spec((1, H))]           # ln2
        inputs += [layer_params["wqkv"], layer_params["bqkv"],
                   layer_params["wo"], layer_params["bo"],
                   layer_params["g1"], layer_params["be1"],
                   layer_params["w1"], layer_params["b1"],
                   layer_params["w2"], layer_params["b2"],
                   layer_params["g2"], layer_params["be2"]]

        out_shapes = [jax.ShapeDtypeStruct((B, S, H), out_dtype)]
        out_specs = [pl.BlockSpec((1, tq, H), lambda b, t: (b, t, 0))]
        if return_attention:
            out_shapes.append(jax.ShapeDtypeStruct((B, n_heads, S, S), attn_dtype))
            out_specs.append(pl.BlockSpec((1, n_heads, tq, S),
                                          lambda b, t: (b, 0, t, 0)))

        scratch_shapes = []
        if not single_tile:
            scratch_shapes.append(pltpu.VMEM((S, 2 * H), jnp.bfloat16))  # cached K|V
        scratch_shapes.append(pltpu.VMEM((tq, H), jnp.bfloat16))         # per-head ctx

        kernel = functools.partial(
            _encoder_layer_kernel, H, n_heads, head_dim, fuse_embed,
            float(embed_scale), single_tile, return_attention, cfg["exp_bf16"])

        call = functools.partial(
            pl.pallas_call, kernel,
            grid=(B, n_q),
            in_specs=in_specs,
            scratch_shapes=scratch_shapes,
            compiler_params=pltpu.CompilerParams(
                dimension_semantics=("parallel", "arbitrary"),
                vmem_limit_bytes=cfg["vmem_limit"]))

        if return_attention:
            out, attn = call(out_shape=tuple(out_shapes),
                             out_specs=tuple(out_specs))(*inputs)
            return out, attn
        out = call(out_shape=out_shapes[0], out_specs=out_specs[0])(*inputs)
        return out, None

    try:
        return run(True)
    except Exception:
        # Fallback if single-buffered weight BlockSpecs (pipeline_mode=pl.Buffered)
        # are not supported by this JAX/Mosaic version.
        return run(False)


def encoder_forward(src, src_mask, params, n_heads, *, attn_dtype=jnp.bfloat16,
                    return_attention=True, tq=None):
    """Mirrors Encoder.forward: returns (src_out, concat(self_attentions, dim=0))."""
    B, S, H = src.shape
    # src_mask comes in PyTorch-style (B, 1, 1, S); squeeze to (B, 1, S) float.
    mask_b1s = src_mask.reshape(B, 1, S).astype(jnp.float32)
    pos = params["pos_emb"][:S]
    embed_scale = math.sqrt(H)
    n_layers = len(params["layers"])

    if n_layers == 0:
        out = src * embed_scale + pos[None]
        attns = jnp.zeros((0, n_heads, S, S), attn_dtype) if return_attention else None
        return out, attns

    attns = []
    x = src
    for li, lp in enumerate(params["layers"]):
        last = li == n_layers - 1
        x, a = encoder_layer(
            x, mask_b1s, lp, n_heads,
            pos_emb=pos if li == 0 else None,          # embed add fused into layer 0
            embed_scale=embed_scale if li == 0 else 1.0,
            attn_dtype=attn_dtype,
            out_dtype=jnp.float32 if last else jnp.bfloat16,   # bf16 between layers
            return_attention=return_attention, tq=tq)
        if return_attention:
            attns.append(a)
    if return_attention:
        return x, jnp.concatenate(attns, axis=0)       # (n_layers * B, heads, S, S)
    return x, None


# ----------------------------- params -------------------------------------------

def init_params(key, hid_dim, pf_dim, n_layers, max_length,
                matmul_dtype=jnp.bfloat16):
    def dense(k, din, dout):
        kw, kb = jax.random.split(k)
        w = 0.05 * jax.random.normal(kw, (din, dout), jnp.float32)
        b = 0.05 * jax.random.normal(kb, (1, dout), jnp.float32)
        return w, b

    keys = jax.random.split(key, n_layers + 1)
    params = {"pos_emb": 0.05 * jax.random.normal(keys[0], (max_length, hid_dim),
                                                  jnp.float32),
              "layers": []}
    for li in range(n_layers):
        ks = jax.random.split(keys[li + 1], 6)
        wq, bq = dense(ks[0], hid_dim, hid_dim)
        wk, bk = dense(ks[1], hid_dim, hid_dim)
        wv, bv = dense(ks[2], hid_dim, hid_dim)
        wo, bo = dense(ks[3], hid_dim, hid_dim)
        w1, b1 = dense(ks[4], hid_dim, pf_dim)
        w2, b2 = dense(ks[5], pf_dim, hid_dim)
        params["layers"].append(dict(
            # fused QKV weight/bias; matmul weights stored in bf16 (MXU-native)
            wqkv=jnp.concatenate([wq, wk, wv], axis=1).astype(matmul_dtype),
            bqkv=jnp.concatenate([bq, bk, bv], axis=1),
            wo=wo.astype(matmul_dtype), bo=bo,
            g1=jnp.ones((1, hid_dim), jnp.float32),
            be1=jnp.zeros((1, hid_dim), jnp.float32),
            w1=w1.astype(matmul_dtype), b1=b1,
            w2=w2.astype(matmul_dtype), b2=b2,
            g2=jnp.ones((1, hid_dim), jnp.float32),
            be2=jnp.zeros((1, hid_dim), jnp.float32)))
    return params


# ----------------------------- main ----------------------------------------------

if __name__ == "__main__":
    root = jax.random.PRNGKey(0)
    k_src, k_par, k_src2 = jax.random.split(root, 3)

    B = 2
    HID, N_HEADS, PF_DIM, N_LAYERS, MAX_LEN = 32, 4, 64, 2, 16
    params = init_params(k_par, HID, PF_DIM, N_LAYERS, MAX_LEN)

    # ---- test 1: short sequence -> single-tile fused QKV path ------------------
    S = 8
    src = jax.random.normal(k_src, (B, S, HID), jnp.float32)
    valid = jnp.array([[1] * S, [1] * (S - 2) + [0, 0]], jnp.float32)
    src_mask = valid.reshape(B, 1, 1, S)        # PyTorch-style (B, 1, 1, S)

    out, attns = encoder_forward(src, src_mask, params, N_HEADS)
    jax.block_until_ready((out, attns))
    assert out.shape == (B, S, HID) and out.dtype == jnp.float32
    assert attns.shape == (N_LAYERS * B, N_HEADS, S, S)

    # attention-probability output can be skipped (it is the largest HBM write)
    out_na, attns_na = encoder_forward(src, src_mask, params, N_HEADS,
                                       return_attention=False)
    jax.block_until_ready(out_na)
    assert out_na.shape == (B, S, HID) and attns_na is None

    # ---- test 2: query-tiled path with K/V cached across tiles -----------------
    S2 = 16
    src2 = jax.random.normal(k_src2, (B, S2, HID), jnp.float32)
    valid2 = jnp.array([[1] * S2, [1] * (S2 - 3) + [0, 0, 0]], jnp.float32)
    src_mask2 = valid2.reshape(B, 1, 1, S2)
    out2, attns2 = encoder_forward(src2, src_mask2, params, N_HEADS, tq=8)
    jax.block_until_ready((out2, attns2))
    assert out2.shape == (B, S2, HID)
    assert attns2.shape == (N_LAYERS * B, N_HEADS, S2, S2)

    print("KERNEL_OK")
</pallas_src>

<mosaic_0001>
module attributes {stable_mosaic.version = 11 : i64} {
  func.func @_encoder_layer_kernel(%arg0: i32, %arg1: i32, %arg2: memref<1x8x32xf32, #tpu.memory_space<vmem>>, %arg3: memref<1x1x8xf32, #tpu.memory_space<vmem>>, %arg4: memref<8x32xf32, #tpu.memory_space<vmem>>, %arg5: memref<32x96xbf16, #tpu.memory_space<vmem>>, %arg6: memref<1x96xf32, #tpu.memory_space<vmem>>, %arg7: memref<32x32xbf16, #tpu.memory_space<vmem>>, %arg8: memref<1x32xf32, #tpu.memory_space<vmem>>, %arg9: memref<1x32xf32, #tpu.memory_space<vmem>>, %arg10: memref<1x32xf32, #tpu.memory_space<vmem>>, %arg11: memref<32x64xbf16, #tpu.memory_space<vmem>>, %arg12: memref<1x64xf32, #tpu.memory_space<vmem>>, %arg13: memref<64x32xbf16, #tpu.memory_space<vmem>>, %arg14: memref<1x32xf32, #tpu.memory_space<vmem>>, %arg15: memref<1x32xf32, #tpu.memory_space<vmem>>, %arg16: memref<1x32xf32, #tpu.memory_space<vmem>>, %arg17: memref<1x8x32xbf16, #tpu.memory_space<vmem>>, %arg18: memref<1x4x8x8xbf16, #tpu.memory_space<vmem>>, %arg19: memref<8x32xbf16, #tpu.memory_space<vmem>>) attributes {dimension_semantics = [#tpu.dimension_semantics<parallel>, #tpu.dimension_semantics<arbitrary>], iteration_bounds = array<i64: 2, 1>, scalar_prefetch = 0 : i64, scratch_operands = 1 : i64, tpu.core_type = #tpu.core_type<tc>, window_params = [{transform_indices = @transform_0, window_bounds = array<i64: 1, 8, 32>}, {transform_indices = @transform_1, window_bounds = array<i64: 1, 1, 8>}, {pipeline_mode = #tpu.pipeline_mode<synchronous>, transform_indices = @transform_2, window_bounds = array<i64: 8, 32>}, {pipeline_mode = #tpu.pipeline_mode<synchronous>, transform_indices = @transform_3, window_bounds = array<i64: 32, 96>}, {pipeline_mode = #tpu.pipeline_mode<synchronous>, transform_indices = @transform_4, window_bounds = array<i64: 1, 96>}, {pipeline_mode = #tpu.pipeline_mode<synchronous>, transform_indices = @transform_5, window_bounds = array<i64: 32, 32>}, {pipeline_mode = #tpu.pipeline_mode<synchronous>, transform_indices = @transform_6, window_bounds = array<i64: 1, 32>}, {pipeline_mode = #tpu.pipeline_mode<synchronous>, transform_indices = @transform_7, window_bounds = array<i64: 1, 32>}, {pipeline_mode = #tpu.pipeline_mode<synchronous>, transform_indices = @transform_8, window_bounds = array<i64: 1, 32>}, {pipeline_mode = #tpu.pipeline_mode<synchronous>, transform_indices = @transform_9, window_bounds = array<i64: 32, 64>}, {pipeline_mode = #tpu.pipeline_mode<synchronous>, transform_indices = @transform_10, window_bounds = array<i64: 1, 64>}, {pipeline_mode = #tpu.pipeline_mode<synchronous>, transform_indices = @transform_11, window_bounds = array<i64: 64, 32>}, {pipeline_mode = #tpu.pipeline_mode<synchronous>, transform_indices = @transform_12, window_bounds = array<i64: 1, 32>}, {pipeline_mode = #tpu.pipeline_mode<synchronous>, transform_indices = @transform_13, window_bounds = array<i64: 1, 32>}, {pipeline_mode = #tpu.pipeline_mode<synchronous>, transform_indices = @transform_14, window_bounds = array<i64: 1, 32>}, {transform_indices = @transform_15, window_bounds = array<i64: 1, 8, 32>}, {transform_indices = @transform_16, window_bounds = array<i64: 1, 4, 8, 8>}]} {
    %c0 = arith.constant 0 : index
    %c0_0 = arith.constant 0 : index
    %c0_1 = arith.constant 0 : index
    %0 = vector.load %arg2[%c0, %c0_0, %c0_1] : memref<1x8x32xf32, #tpu.memory_space<vmem>>, vector<1x8x32xf32>
    %1 = vector.shape_cast %0 : vector<1x8x32xf32> to vector<8x32xf32>
    %cst = arith.constant 5.65685415 : f32
    %2 = vector.broadcast %cst : f32 to vector<8x32xf32>
    %3 = arith.mulf %1, %2 : vector<8x32xf32>
    %c0_2 = arith.constant 0 : index
    %c0_3 = arith.constant 0 : index
    %4 = vector.load %arg4[%c0_2, %c0_3] : memref<8x32xf32, #tpu.memory_space<vmem>>, vector<8x32xf32>
    %5 = arith.addf %3, %4 : vector<8x32xf32>
    %6 = arith.truncf %5 : vector<8x32xf32> to vector<8x32xbf16>
    %c0_4 = arith.constant 0 : index
    %c0_5 = arith.constant 0 : index
    %7 = vector.load %arg5[%c0_4, %c0_5] : memref<32x96xbf16, #tpu.memory_space<vmem>>, vector<32x96xbf16>
    %cst_6 = arith.constant dense<0.000000e+00> : vector<8x96xf32>
    %8 = tpu.matmul %6, %7, %cst_6 {dimension_numbers = #tpu.dot_dimension_numbers<[1], [0], [0], [1], [0, 0, 1, 1], [], []>} : vector<8x32xbf16>, vector<32x96xbf16>, vector<8x96xf32> -> vector<8x96xf32>
    %c0_7 = arith.constant 0 : index
    %c0_8 = arith.constant 0 : index
    %9 = vector.load %arg6[%c0_7, %c0_8] : memref<1x96xf32, #tpu.memory_space<vmem>>, vector<1x96xf32>
    %10 = vector.broadcast %9 : vector<1x96xf32> to vector<8x96xf32>
    %11 = arith.addf %8, %10 : vector<8x96xf32>
    %12 = vector.extract_strided_slice %11 {offsets = [0, 0], sizes = [8, 32], strides = [1, 1]} : vector<8x96xf32> to vector<8x32xf32>
    %13 = vector.extract_strided_slice %11 {offsets = [0, 32], sizes = [8, 32], strides = [1, 1]} : vector<8x96xf32> to vector<8x32xf32>
    %14 = arith.truncf %13 : vector<8x32xf32> to vector<8x32xbf16>
    %15 = vector.extract_strided_slice %11 {offsets = [0, 64], sizes = [8, 32], strides = [1, 1]} : vector<8x96xf32> to vector<8x32xf32>
    %16 = arith.truncf %15 : vector<8x32xf32> to vector<8x32xbf16>
    %cst_9 = arith.constant 0.353553385 : f32
    %17 = vector.broadcast %cst_9 : f32 to vector<8x32xf32>
    %18 = arith.mulf %12, %17 : vector<8x32xf32>
    %c0_10 = arith.constant 0 : index
    %c0_11 = arith.constant 0 : index
    %c0_12 = arith.constant 0 : index
    %19 = vector.load %arg3[%c0_10, %c0_11, %c0_12] : memref<1x1x8xf32, #tpu.memory_space<vmem>>, vector<1x1x8xf32>
    %20 = vector.shape_cast %19 : vector<1x1x8xf32> to vector<1x8xf32>
    %cst_13 = arith.constant 0.000000e+00 : f32
    %21 = vector.broadcast %cst_13 : f32 to vector<1x8xf32>
    %22 = arith.cmpf oeq, %20, %21 : vector<1x8xf32>
    %23 = arith.truncf %18 : vector<8x32xf32> to vector<8x32xbf16>
    %24 = vector.extract_strided_slice %23 {offsets = [0, 0], sizes = [8, 8], strides = [1, 1]} : vector<8x32xbf16> to vector<8x8xbf16>
    %25 = vector.extract_strided_slice %14 {offsets = [0, 0], sizes = [8, 8], strides = [1, 1]} : vector<8x32xbf16> to vector<8x8xbf16>
    %cst_14 = arith.constant dense<0.000000e+00> : vector<8x8xf32>
    %26 = tpu.matmul %24, %25, %cst_14 {dimension_numbers = #tpu.dot_dimension_numbers<[1], [1], [0], [0], [0, 0, 1, 0], [], []>} : vector<8x8xbf16>, vector<8x8xbf16>, vector<8x8xf32> -> vector<8x8xf32>
    %cst_15 = arith.constant -1.000000e+10 : f32
    %27 = vector.shape_cast %22 : vector<1x8xi1> to vector<1x8xi1>
    %28 = vector.broadcast %27 : vector<1x8xi1> to vector<8x8xi1>
    %29 = vector.broadcast %cst_15 : f32 to vector<8x8xf32>
    %30 = arith.select %28, %29, %26 : vector<8x8xi1>, vector<8x8xf32>
    %cst_16 = arith.constant dense<0xFF800000> : vector<8xf32>
    %31 = vector.multi_reduction <maximumf>, %30, %cst_16 [1] : vector<8x8xf32> to vector<8xf32>
    %32 = vector.shape_cast %31 : vector<8xf32> to vector<8x1xf32>
    %33 = vector.broadcast %32 : vector<8x1xf32> to vector<8x8xf32>
    %34 = arith.subf %30, %33 : vector<8x8xf32>
    %35 = math.exp %34 : vector<8x8xf32>
    %cst_17 = arith.constant dense<0.000000e+00> : vector<8xf32>
    %36 = vector.multi_reduction <add>, %35, %cst_17 [1] : vector<8x8xf32> to vector<8xf32>
    %37 = vector.shape_cast %36 : vector<8xf32> to vector<8x1xf32>
    %38 = tpu.reciprocal %37 {approx = true} : vector<8x1xf32> -> vector<8x1xf32>
    %39 = vector.broadcast %38 : vector<8x1xf32> to vector<8x8xf32>
    %40 = arith.mulf %35, %39 : vector<8x8xf32>
    %41 = arith.truncf %40 : vector<8x8xf32> to vector<8x8xbf16>
    %c0_18 = arith.constant 0 : index
    %c0_19 = arith.constant 0 : index
    %c0_20 = arith.constant 0 : index
    %c0_21 = arith.constant 0 : index
    %42 = vector.load %arg18[%c0_18, %c0_19, %c0_20, %c0_21] : memref<1x4x8x8xbf16, #tpu.memory_space<vmem>>, vector<1x1x8x8xbf16>
    %43 = vector.shape_cast %42 : vector<1x1x8x8xbf16> to vector<8x8xbf16>
    %44 = vector.shape_cast %41 : vector<8x8xbf16> to vector<1x1x8x8xbf16>
    tpu.vector_store %arg18[%c0_18, %c0_19, %c0_20, %c0_21], %44 {strides = array<i32>} : memref<1x4x8x8xbf16, #tpu.memory_space<vmem>>, vector<1x1x8x8xbf16>,
    %45 = arith.truncf %40 : vector<8x8xf32> to vector<8x8xbf16>
    %46 = vector.extract_strided_slice %16 {offsets = [0, 0], sizes = [8, 8], strides = [1, 1]} : vector<8x32xbf16> to vector<8x8xbf16>
    %cst_22 = arith.constant dense<0.000000e+00> : vector<8x8xf32>
    %47 = tpu.matmul %45, %46, %cst_22 {dimension_numbers = #tpu.dot_dimension_numbers<[1], [0], [0], [1], [0, 0, 1, 1], [], []>} : vector<8x8xbf16>, vector<8x8xbf16>, vector<8x8xf32> -> vector<8x8xf32>
    %48 = arith.truncf %47 : vector<8x8xf32> to vector<8x8xbf16>
    %c0_23 = arith.constant 0 : index
    %c0_24 = arith.constant 0 : index
    %49 = vector.load %arg19[%c0_23, %c0_24] : memref<8x32xbf16, #tpu.memory_space<vmem>>, vector<8x8xbf16>
    tpu.vector_store %arg19[%c0_23, %c0_24], %48 {strides = array<i32>} : memref<8x32xbf16, #tpu.memory_space<vmem>>, vector<8x8xbf16>,
    %50 = vector.extract_strided_slice %23 {offsets = [0, 8], sizes = [8, 8], strides = [1, 1]} : vector<8x32xbf16> to vector<8x8xbf16>
    %51 = vector.extract_strided_slice %14 {offsets = [0, 8], sizes = [8, 8], strides = [1, 1]} : vector<8x32xbf16> to vector<8x8xbf16>
    %cst_25 = arith.constant dense<0.000000e+00> : vector<8x8xf32>
    %52 = tpu.matmul %50, %51, %cst_25 {dimension_numbers = #tpu.dot_dimension_numbers<[1], [1], [0], [0], [0, 0, 1, 0], [], []>} : vector<8x8xbf16>, vector<8x8xbf16>, vector<8x8xf32> -> vector<8x8xf32>
    %cst_26 = arith.constant -1.000000e+10 : f32
    %53 = vector.shape_cast %22 : vector<1x8xi1> to vector<1x8xi1>
    %54 = vector.broadcast %53 : vector<1x8xi1> to vector<8x8xi1>
    %55 = vector.broadcast %cst_26 : f32 to vector<8x8xf32>
    %56 = arith.select %54, %55, %52 : vector<8x8xi1>, vector<8x8xf32>
    %cst_27 = arith.constant dense<0xFF800000> : vector<8xf32>
    %57 = vector.multi_reduction <maximumf>, %56, %cst_27 [1] : vector<8x8xf32> to vector<8xf32>
    %58 = vector.shape_cast %57 : vector<8xf32> to vector<8x1xf32>
    %59 = vector.broadcast %58 : vector<8x1xf32> to vector<8x8xf32>
    %60 = arith.subf %56, %59 : vector<8x8xf32>
    %61 = math.exp %60 : vector<8x8xf32>
    %cst_28 = arith.constant dense<0.000000e+00> : vector<8xf32>
    %62 = vector.multi_reduction <add>, %61, %cst_28 [1] : vector<8x8xf32> to vector<8xf32>
    %63 = vector.shape_cast %62 : vector<8xf32> to vector<8x1xf32>
    %64 = tpu.reciprocal %63 {approx = true} : vector<8x1xf32> -> vector<8x1xf32>
    %65 = vector.broadcast %64 : vector<8x1xf32> to vector<8x8xf32>
    %66 = arith.mulf %61, %65 : vector<8x8xf32>
    %67 = arith.truncf %66 : vector<8x8xf32> to vector<8x8xbf16>
    %c0_29 = arith.constant 0 : index
    %c1 = arith.constant 1 : index
    %c0_30 = arith.constant 0 : index
    %c0_31 = arith.constant 0 : index
    %68 = vector.load %arg18[%c0_29, %c1, %c0_30, %c0_31] : memref<1x4x8x8xbf16, #tpu.memory_space<vmem>>, vector<1x1x8x8xbf16>
    %69 = vector.shape_cast %68 : vector<1x1x8x8xbf16> to vector<8x8xbf16>
    %70 = vector.shape_cast %67 : vector<8x8xbf16> to vector<1x1x8x8xbf16>
    tpu.vector_store %arg18[%c0_29, %c1, %c0_30, %c0_31], %70 {strides = array<i32>} : memref<1x4x8x8xbf16, #tpu.memory_space<vmem>>, vector<1x1x8x8xbf16>,
    %71 = arith.truncf %66 : vector<8x8xf32> to vector<8x8xbf16>
    %72 = vector.extract_strided_slice %16 {offsets = [0, 8], sizes = [8, 8], strides = [1, 1]} : vector<8x32xbf16> to vector<8x8xbf16>
    %cst_32 = arith.constant dense<0.000000e+00> : vector<8x8xf32>
    %73 = tpu.matmul %71, %72, %cst_32 {dimension_numbers = #tpu.dot_dimension_numbers<[1], [0], [0], [1], [0, 0, 1, 1], [], []>} : vector<8x8xbf16>, vector<8x8xbf16>, vector<8x8xf32> -> vector<8x8xf32>
    %74 = arith.truncf %73 : vector<8x8xf32> to vector<8x8xbf16>
    %c0_33 = arith.constant 0 : index
    %c8 = arith.constant 8 : index
    %75 = vector.load %arg19[%c0_33, %c8] : memref<8x32xbf16, #tpu.memory_space<vmem>>, vector<8x8xbf16>
    tpu.vector_store %arg19[%c0_33, %c8], %74 {strides = array<i32>} : memref<8x32xbf16, #tpu.memory_space<vmem>>, vector<8x8xbf16>,
    %76 = vector.extract_strided_slice %23 {offsets = [0, 16], sizes = [8, 8], strides = [1, 1]} : vector<8x32xbf16> to vector<8x8xbf16>
    %77 = vector.extract_strided_slice %14 {offsets = [0, 16], sizes = [8, 8], strides = [1, 1]} : vector<8x32xbf16> to vector<8x8xbf16>
    %cst_34 = arith.constant dense<0.000000e+00> : vector<8x8xf32>
    %78 = tpu.matmul %76, %77, %cst_34 {dimension_numbers = #tpu.dot_dimension_numbers<[1], [1], [0], [0], [0, 0, 1, 0], [], []>} : vector<8x8xbf16>, vector<8x8xbf16>, vector<8x8xf32> -> vector<8x8xf32>
    %cst_35 = arith.constant -1.000000e+10 : f32
    %79 = vector.shape_cast %22 : vector<1x8xi1> to vector<1x8xi1>
    %80 = vector.broadcast %79 : vector<1x8xi1> to vector<8x8xi1>
    %81 = vector.broadcast %cst_35 : f32 to vector<8x8xf32>
    %82 = arith.select %80, %81, %78 : vector<8x8xi1>, vector<8x8xf32>
    %cst_36 = arith.constant dense<0xFF800000> : vector<8xf32>
    %83 = vector.multi_reduction <maximumf>, %82, %cst_36 [1] : vector<8x8xf32> to vector<8xf32>
    %84 = vector.shape_cast %83 : vector<8xf32> to vector<8x1xf32>
    %85 = vector.broadcast %84 : vector<8x1xf32> to vector<8x8xf32>
    %86 = arith.subf %82, %85 : vector<8x8xf32>
    %87 = math.exp %86 : vector<8x8xf32>
    %cst_37 = arith.constant dense<0.000000e+00> : vector<8xf32>
    %88 = vector.multi_reduction <add>, %87, %cst_37 [1] : vector<8x8xf32> to vector<8xf32>
    %89 = vector.shape_cast %88 : vector<8xf32> to vector<8x1xf32>
    %90 = tpu.reciprocal %89 {approx = true} : vector<8x1xf32> -> vector<8x1xf32>
    %91 = vector.broadcast %90 : vector<8x1xf32> to vector<8x8xf32>
    %92 = arith.mulf %87, %91 : vector<8x8xf32>
    %93 = arith.truncf %92 : vector<8x8xf32> to vector<8x8xbf16>
    %c0_38 = arith.constant 0 : index
    %c2 = arith.constant 2 : index
    %c0_39 = arith.constant 0 : index
    %c0_40 = arith.constant 0 : index
    %94 = vector.load %arg18[%c0_38, %c2, %c0_39, %c0_40] : memref<1x4x8x8xbf16, #tpu.memory_space<vmem>>, vector<1x1x8x8xbf16>
    %95 = vector.shape_cast %94 : vector<1x1x8x8xbf16> to vector<8x8xbf16>
    %96 = vector.shape_cast %93 : vector<8x8xbf16> to vector<1x1x8x8xbf16>
    tpu.vector_store %arg18[%c0_38, %c2, %c0_39, %c0_40], %96 {strides = array<i32>} : memref<1x4x8x8xbf16, #tpu.memory_space<vmem>>, vector<1x1x8x8xbf16>,
    %97 = arith.truncf %92 : vector<8x8xf32> to vector<8x8xbf16>
    %98 = vector.extract_strided_slice %16 {offsets = [0, 16], sizes = [8, 8], strides = [1, 1]} : vector<8x32xbf16> to vector<8x8xbf16>
    %cst_41 = arith.constant dense<0.000000e+00> : vector<8x8xf32>
    %99 = tpu.matmul %97, %98, %cst_41 {dimension_numbers = #tpu.dot_dimension_numbers<[1], [0], [0], [1], [0, 0, 1, 1], [], []>} : vector<8x8xbf16>, vector<8x8xbf16>, vector<8x8xf32> -> vector<8x8xf32>
    %100 = arith.truncf %99 : vector<8x8xf32> to vector<8x8xbf16>
    %c0_42 = arith.constant 0 : index
    %c16 = arith.constant 16 : index
    %101 = vector.load %arg19[%c0_42, %c16] : memref<8x32xbf16, #tpu.memory_space<vmem>>, vector<8x8xbf16>
    tpu.vector_store %arg19[%c0_42, %c16], %100 {strides = array<i32>} : memref<8x32xbf16, #tpu.memory_space<vmem>>, vector<8x8xbf16>,
    %102 = vector.extract_strided_slice %23 {offsets = [0, 24], sizes = [8, 8], strides = [1, 1]} : vector<8x32xbf16> to vector<8x8xbf16>
    %103 = vector.extract_strided_slice %14 {offsets = [0, 24], sizes = [8, 8], strides = [1, 1]} : vector<8x32xbf16> to vector<8x8xbf16>
    %cst_43 = arith.constant dense<0.000000e+00> : vector<8x8xf32>
    %104 = tpu.matmul %102, %103, %cst_43 {dimension_numbers = #tpu.dot_dimension_numbers<[1], [1], [0], [0], [0, 0, 1, 0], [], []>} : vector<8x8xbf16>, vector<8x8xbf16>, vector<8x8xf32> -> vector<8x8xf32>
    %cst_44 = arith.constant -1.000000e+10 : f32
    %105 = vector.shape_cast %22 : vector<1x8xi1> to vector<1x8xi1>
    %106 = vector.broadcast %105 : vector<1x8xi1> to vector<8x8xi1>
    %107 = vector.broadcast %cst_44 : f32 to vector<8x8xf32>
    %108 = arith.select %106, %107, %104 : vector<8x8xi1>, vector<8x8xf32>
    %cst_45 = arith.constant dense<0xFF800000> : vector<8xf32>
    %109 = vector.multi_reduction <maximumf>, %108, %cst_45 [1] : vector<8x8xf32> to vector<8xf32>
    %110 = vector.shape_cast %109 : vector<8xf32> to vector<8x1xf32>
    %111 = vector.broadcast %110 : vector<8x1xf32> to vector<8x8xf32>
    %112 = arith.subf %108, %111 : vector<8x8xf32>
    %113 = math.exp %112 : vector<8x8xf32>
    %cst_46 = arith.constant dense<0.000000e+00> : vector<8xf32>
    %114 = vector.multi_reduction <add>, %113, %cst_46 [1] : vector<8x8xf32> to vector<8xf32>
    %115 = vector.shape_cast %114 : vector<8xf32> to vector<8x1xf32>
    %116 = tpu.reciprocal %115 {approx = true} : vector<8x1xf32> -> vector<8x1xf32>
    %117 = vector.broadcast %116 : vector<8x1xf32> to vector<8x8xf32>
    %118 = arith.mulf %113, %117 : vector<8x8xf32>
    %119 = arith.truncf %118 : vector<8x8xf32> to vector<8x8xbf16>
    %c0_47 = arith.constant 0 : index
    %c3 = arith.constant 3 : index
    %c0_48 = arith.constant 0 : index
    %c0_49 = arith.constant 0 : index
    %120 = vector.load %arg18[%c0_47, %c3, %c0_48, %c0_49] : memref<1x4x8x8xbf16, #tpu.memory_space<vmem>>, vector<1x1x8x8xbf16>
    %121 = vector.shape_cast %120 : vector<1x1x8x8xbf16> to vector<8x8xbf16>
    %122 = vector.shape_cast %119 : vector<8x8xbf16> to vector<1x1x8x8xbf16>
    tpu.vector_store %arg18[%c0_47, %c3, %c0_48, %c0_49], %122 {strides = array<i32>} : memref<1x4x8x8xbf16, #tpu.memory_space<vmem>>, vector<1x1x8x8xbf16>,
    %123 = arith.truncf %118 : vector<8x8xf32> to vector<8x8xbf16>
    %124 = vector.extract_strided_slice %16 {offsets = [0, 24], sizes = [8, 8], strides = [1, 1]} : vector<8x32xbf16> to vector<8x8xbf16>
    %cst_50 = arith.constant dense<0.000000e+00> : vector<8x8xf32>
    %125 = tpu.matmul %123, %124, %cst_50 {dimension_numbers = #tpu.dot_dimension_numbers<[1], [0], [0], [1], [0, 0, 1, 1], [], []>} : vector<8x8xbf16>, vector<8x8xbf16>, vector<8x8xf32> -> vector<8x8xf32>
    %126 = arith.truncf %125 : vector<8x8xf32> to vector<8x8xbf16>
    %c0_51 = arith.constant 0 : index
    %c24 = arith.constant 24 : index
    %127 = vector.load %arg19[%c0_51, %c24] : memref<8x32xbf16, #tpu.memory_space<vmem>>, vector<8x8xbf16>
    tpu.vector_store %arg19[%c0_51, %c24], %126 {strides = array<i32>} : memref<8x32xbf16, #tpu.memory_space<vmem>>, vector<8x8xbf16>,
    %c0_52 = arith.constant 0 : index
    %c0_53 = arith.constant 0 : index
    %128 = vector.load %arg19[%c0_52, %c0_53] : memref<8x32xbf16, #tpu.memory_space<vmem>>, vector<8x32xbf16>
    %c0_54 = arith.constant 0 : index
    %c0_55 = arith.constant 0 : index
    %129 = vector.load %arg7[%c0_54, %c0_55] : memref<32x32xbf16, #tpu.memory_space<vmem>>, vector<32x32xbf16>
    %cst_56 = arith.constant dense<0.000000e+00> : vector<8x32xf32>
    %130 = tpu.matmul %128, %129, %cst_56 {dimension_numbers = #tpu.dot_dimension_numbers<[1], [0], [0], [1], [0, 0, 1, 1], [], []>} : vector<8x32xbf16>, vector<32x32xbf16>, vector<8x32xf32> -> vector<8x32xf32>
    %c0_57 = arith.constant 0 : index
    %c0_58 = arith.constant 0 : index
    %131 = vector.load %arg8[%c0_57, %c0_58] : memref<1x32xf32, #tpu.memory_space<vmem>>, vector<1x32xf32>
    %132 = vector.broadcast %131 : vector<1x32xf32> to vector<8x32xf32>
    %133 = arith.addf %130, %132 : vector<8x32xf32>
    %134 = arith.addf %5, %133 : vector<8x32xf32>
    %c0_59 = arith.constant 0 : index
    %c0_60 = arith.constant 0 : index
    %135 = vector.load %arg9[%c0_59, %c0_60] : memref<1x32xf32, #tpu.memory_space<vmem>>, vector<1x32xf32>
    %c0_61 = arith.constant 0 : index
    %c0_62 = arith.constant 0 : index
    %136 = vector.load %arg10[%c0_61, %c0_62] : memref<1x32xf32, #tpu.memory_space<vmem>>, vector<1x32xf32>
    %cst_63 = arith.constant dense<0.000000e+00> : vector<8xf32>
    %137 = vector.multi_reduction <add>, %134, %cst_63 [1] : vector<8x32xf32> to vector<8xf32>
    %138 = vector.shape_cast %137 : vector<8xf32> to vector<8x1xf32>
    %cst_64 = arith.constant 3.200000e+01 : f32
    %139 = vector.broadcast %cst_64 : f32 to vector<8x1xf32>
    %140 = arith.divf %138, %139 : vector<8x1xf32>
    %141 = vector.broadcast %140 : vector<8x1xf32> to vector<8x32xf32>
    %142 = arith.subf %134, %141 : vector<8x32xf32>
    %143 = arith.mulf %142, %142 : vector<8x32xf32>
    %cst_65 = arith.constant dense<0.000000e+00> : vector<8xf32>
    %144 = vector.multi_reduction <add>, %143, %cst_65 [1] : vector<8x32xf32> to vector<8xf32>
    %145 = vector.shape_cast %144 : vector<8xf32> to vector<8x1xf32>
    %cst_66 = arith.constant 3.200000e+01 : f32
    %146 = vector.broadcast %cst_66 : f32 to vector<8x1xf32>
    %147 = arith.divf %145, %146 : vector<8x1xf32>
    %148 = vector.broadcast %140 : vector<8x1xf32> to vector<8x32xf32>
    %149 = arith.subf %134, %148 : vector<8x32xf32>
    %cst_67 = arith.constant 9.99999974E-6 : f32
    %150 = vector.broadcast %cst_67 : f32 to vector<8x1xf32>
    %151 = arith.addf %147, %150 : vector<8x1xf32>
    %152 = math.rsqrt %151 : vector<8x1xf32>
    %153 = vector.broadcast %152 : vector<8x1xf32> to vector<8x32xf32>
    %154 = arith.mulf %149, %153 : vector<8x32xf32>
    %155 = vector.broadcast %135 : vector<1x32xf32> to vector<8x32xf32>
    %156 = arith.mulf %154, %155 : vector<8x32xf32>
    %157 = vector.broadcast %136 : vector<1x32xf32> to vector<8x32xf32>
    %158 = arith.addf %156, %157 : vector<8x32xf32>
    %159 = arith.truncf %158 : vector<8x32xf32> to vector<8x32xbf16>
    %c0_68 = arith.constant 0 : index
    %c0_69 = arith.constant 0 : index
    %160 = vector.load %arg11[%c0_68, %c0_69] : memref<32x64xbf16, #tpu.memory_space<vmem>>, vector<32x64xbf16>
    %cst_70 = arith.constant dense<0.000000e+00> : vector<8x64xf32>
    %161 = tpu.matmul %159, %160, %cst_70 {dimension_numbers = #tpu.dot_dimension_numbers<[1], [0], [0], [1], [0, 0, 1, 1], [], []>} : vector<8x32xbf16>, vector<32x64xbf16>, vector<8x64xf32> -> vector<8x64xf32>
    %c0_71 = arith.constant 0 : index
    %c0_72 = arith.constant 0 : index
    %162 = vector.load %arg12[%c0_71, %c0_72] : memref<1x64xf32, #tpu.memory_space<vmem>>, vector<1x64xf32>
    %163 = vector.broadcast %162 : vector<1x64xf32> to vector<8x64xf32>
    %164 = arith.addf %161, %163 : vector<8x64xf32>
    %cst_73 = arith.constant 0.000000e+00 : f32
    %165 = vector.broadcast %cst_73 : f32 to vector<8x64xf32>
    %166 = arith.maximumf %164, %165 : vector<8x64xf32>
    %167 = arith.truncf %166 : vector<8x64xf32> to vector<8x64xbf16>
    %c0_74 = arith.constant 0 : index
    %c0_75 = arith.constant 0 : index
    %168 = vector.load %arg13[%c0_74, %c0_75] : memref<64x32xbf16, #tpu.memory_space<vmem>>, vector<64x32xbf16>
    %cst_76 = arith.constant dense<0.000000e+00> : vector<8x32xf32>
    %169 = tpu.matmul %167, %168, %cst_76 {dimension_numbers = #tpu.dot_dimension_numbers<[1], [0], [0], [1], [0, 0, 1, 1], [], []>} : vector<8x64xbf16>, vector<64x32xbf16>, vector<8x32xf32> -> vector<8x32xf32>
    %c0_77 = arith.constant 0 : index
    %c0_78 = arith.constant 0 : index
    %170 = vector.load %arg14[%c0_77, %c0_78] : memref<1x32xf32, #tpu.memory_space<vmem>>, vector<1x32xf32>
    %171 = vector.broadcast %170 : vector<1x32xf32> to vector<8x32xf32>
    %172 = arith.addf %169, %171 : vector<8x32xf32>
    %173 = arith.addf %158, %172 : vector<8x32xf32>
    %c0_79 = arith.constant 0 : index
    %c0_80 = arith.constant 0 : index
    %174 = vector.load %arg15[%c0_79, %c0_80] : memref<1x32xf32, #tpu.memory_space<vmem>>, vector<1x32xf32>
    %c0_81 = arith.constant 0 : index
    %c0_82 = arith.constant 0 : index
    %175 = vector.load %arg16[%c0_81, %c0_82] : memref<1x32xf32, #tpu.memory_space<vmem>>, vector<1x32xf32>
    %cst_83 = arith.constant dense<0.000000e+00> : vector<8xf32>
    %176 = vector.multi_reduction <add>, %173, %cst_83 [1] : vector<8x32xf32> to vector<8xf32>
    %177 = vector.shape_cast %176 : vector<8xf32> to vector<8x1xf32>
    %cst_84 = arith.constant 3.200000e+01 : f32
    %178 = vector.broadcast %cst_84 : f32 to vector<8x1xf32>
    %179 = arith.divf %177, %178 : vector<8x1xf32>
    %180 = vector.broadcast %179 : vector<8x1xf32> to vector<8x32xf32>
    %181 = arith.subf %173, %180 : vector<8x32xf32>
    %182 = arith.mulf %181, %181 : vector<8x32xf32>
    %cst_85 = arith.constant dense<0.000000e+00> : vector<8xf32>
    %183 = vector.multi_reduction <add>, %182, %cst_85 [1] : vector<8x32xf32> to vector<8xf32>
    %184 = vector.shape_cast %183 : vector<8xf32> to vector<8x1xf32>
    %cst_86 = arith.constant 3.200000e+01 : f32
    %185 = vector.broadcast %cst_86 : f32 to vector<8x1xf32>
    %186 = arith.divf %184, %185 : vector<8x1xf32>
    %187 = vector.broadcast %179 : vector<8x1xf32> to vector<8x32xf32>
    %188 = arith.subf %173, %187 : vector<8x32xf32>
    %cst_87 = arith.constant 9.99999974E-6 : f32
    %189 = vector.broadcast %cst_87 : f32 to vector<8x1xf32>
    %190 = arith.addf %186, %189 : vector<8x1xf32>
    %191 = math.rsqrt %190 : vector<8x1xf32>
    %192 = vector.broadcast %191 : vector<8x1xf32> to vector<8x32xf32>
    %193 = arith.mulf %188, %192 : vector<8x32xf32>
    %194 = vector.broadcast %174 : vector<1x32xf32> to vector<8x32xf32>
    %195 = arith.mulf %193, %194 : vector<8x32xf32>
    %196 = vector.broadcast %175 : vector<1x32xf32> to vector<8x32xf32>
    %197 = arith.addf %195, %196 : vector<8x32xf32>
    %198 = arith.truncf %197 : vector<8x32xf32> to vector<8x32xbf16>
    %c0_88 = arith.constant 0 : index
    %c0_89 = arith.constant 0 : index
    %c0_90 = arith.constant 0 : index
    %199 = vector.load %arg17[%c0_88, %c0_89, %c0_90] : memref<1x8x32xbf16, #tpu.memory_space<vmem>>, vector<1x8x32xbf16>
    %200 = vector.shape_cast %199 : vector<1x8x32xbf16> to vector<8x32xbf16>
    %201 = vector.shape_cast %198 : vector<8x32xbf16> to vector<1x8x32xbf16>
    tpu.vector_store %arg17[%c0_88, %c0_89, %c0_90], %201 {strides = array<i32>} : memref<1x8x32xbf16, #tpu.memory_space<vmem>>, vector<1x8x32xbf16>,
    return
  }
  func.func @transform_0(%arg0: i32, %arg1: i32) -> (i32, i32, i32) {
    %c0_i32 = arith.constant 0 : i32
    %c0_i32_0 = arith.constant 0 : i32
    %c0_i32_1 = arith.constant 0 : i32
    return %arg0, %c0_i32, %c0_i32_0 : i32, i32, i32
  }
  func.func @transform_1(%arg0: i32, %arg1: i32) -> (i32, i32, i32) {
    %c0_i32 = arith.constant 0 : i32
    %c0_i32_0 = arith.constant 0 : i32
    %c0_i32_1 = arith.constant 0 : i32
    return %arg0, %c0_i32, %c0_i32_0 : i32, i32, i32
  }
  func.func @transform_2(%arg0: i32, %arg1: i32) -> (i32, i32) {
    %c0_i32 = arith.constant 0 : i32
    %c0_i32_0 = arith.constant 0 : i32
    %c0_i32_1 = arith.constant 0 : i32
    return %c0_i32, %c0_i32_0 : i32, i32
  }
  func.func @transform_3(%arg0: i32, %arg1: i32) -> (i32, i32) {
    %c0_i32 = arith.constant 0 : i32
    %c0_i32_0 = arith.constant 0 : i32
    %c0_i32_1 = arith.constant 0 : i32
    return %c0_i32, %c0_i32_0 : i32, i32
  }
  func.func @transform_4(%arg0: i32, %arg1: i32) -> (i32, i32) {
    %c0_i32 = arith.constant 0 : i32
    %c0_i32_0 = arith.constant 0 : i32
    %c0_i32_1 = arith.constant 0 : i32
    return %c0_i32, %c0_i32_0 : i32, i32
  }
  func.func @transform_5(%arg0: i32, %arg1: i32) -> (i32, i32) {
    %c0_i32 = arith.constant 0 : i32
    %c0_i32_0 = arith.constant 0 : i32
    %c0_i32_1 = arith.constant 0 : i32
    return %c0_i32, %c0_i32_0 : i32, i32
  }
  func.func @transform_6(%arg0: i32, %arg1: i32) -> (i32, i32) {
    %c0_i32 = arith.constant 0 : i32
    %c0_i32_0 = arith.constant 0 : i32
    %c0_i32_1 = arith.constant 0 : i32
    return %c0_i32, %c0_i32_0 : i32, i32
  }
  func.func @transform_7(%arg0: i32, %arg1: i32) -> (i32, i32) {
    %c0_i32 = arith.constant 0 : i32
    %c0_i32_0 = arith.constant 0 : i32
    %c0_i32_1 = arith.constant 0 : i32
    return %c0_i32, %c0_i32_0 : i32, i32
  }
  func.func @transform_8(%arg0: i32, %arg1: i32) -> (i32, i32) {
    %c0_i32 = arith.constant 0 : i32
    %c0_i32_0 = arith.constant 0 : i32
    %c0_i32_1 = arith.constant 0 : i32
    return %c0_i32, %c0_i32_0 : i32, i32
  }
  func.func @transform_9(%arg0: i32, %arg1: i32) -> (i32, i32) {
    %c0_i32 = arith.constant 0 : i32
    %c0_i32_0 = arith.constant 0 : i32
    %c0_i32_1 = arith.constant 0 : i32
    return %c0_i32, %c0_i32_0 : i32, i32
  }
  func.func @transform_10(%arg0: i32, %arg1: i32) -> (i32, i32) {
    %c0_i32 = arith.constant 0 : i32
    %c0_i32_0 = arith.constant 0 : i32
    %c0_i32_1 = arith.constant 0 : i32
    return %c0_i32, %c0_i32_0 : i32, i32
  }
  func.func @transform_11(%arg0: i32, %arg1: i32) -> (i32, i32) {
    %c0_i32 = arith.constant 0 : i32
    %c0_i32_0 = arith.constant 0 : i32
    %c0_i32_1 = arith.constant 0 : i32
    return %c0_i32, %c0_i32_0 : i32, i32
  }
  func.func @transform_12(%arg0: i32, %arg1: i32) -> (i32, i32) {
    %c0_i32 = arith.constant 0 : i32
    %c0_i32_0 = arith.constant 0 : i32
    %c0_i32_1 = arith.constant 0 : i32
    return %c0_i32, %c0_i32_0 : i32, i32
  }
  func.func @transform_13(%arg0: i32, %arg1: i32) -> (i32, i32) {
    %c0_i32 = arith.constant 0 : i32
    %c0_i32_0 = arith.constant 0 : i32
    %c0_i32_1 = arith.constant 0 : i32
    return %c0_i32, %c0_i32_0 : i32, i32
  }
  func.func @transform_14(%arg0: i32, %arg1: i32) -> (i32, i32) {
    %c0_i32 = arith.constant 0 : i32
    %c0_i32_0 = arith.constant 0 : i32
    %c0_i32_1 = arith.constant 0 : i32
    return %c0_i32, %c0_i32_0 : i32, i32
  }
  func.func @transform_15(%arg0: i32, %arg1: i32) -> (i32, i32, i32) {
    %c0_i32 = arith.constant 0 : i32
    %c0_i32_0 = arith.constant 0 : i32
    return %arg0, %arg1, %c0_i32 : i32, i32, i32
  }
  func.func @transform_16(%arg0: i32, %arg1: i32) -> (i32, i32, i32, i32) {
    %c0_i32 = arith.constant 0 : i32
    %c0_i32_0 = arith.constant 0 : i32
    %c0_i32_1 = arith.constant 0 : i32
    return %arg0, %c0_i32, %arg1, %c0_i32_0 : i32, i32, i32, i32
  }
}

module attributes {stable_mosaic.version = 11 : i64} {
  func.func @_encoder_layer_kernel(%arg0: i32, %arg1: i32, %arg2: memref<1x8x32xf32, #tpu.memory_space<vmem>>, %arg3: memref<1x1x8xf32, #tpu.memory_space<vmem>>, %arg4: memref<8x32xf32, #tpu.memory_space<vmem>>, %arg5: memref<32x96xbf16, #tpu.memory_space<vmem>>, %arg6: memref<1x96xf32, #tpu.memory_space<vmem>>, %arg7: memref<32x32xbf16, #tpu.memory_space<vmem>>, %arg8: memref<1x32xf32, #tpu.memory_space<vmem>>, %arg9: memref<1x32xf32, #tpu.memory_space<vmem>>, %arg10: memref<1x32xf32, #tpu.memory_space<vmem>>, %arg11: memref<32x64xbf16, #tpu.memory_space<vmem>>, %arg12: memref<1x64xf32, #tpu.memory_space<vmem>>, %arg13: memref<64x32xbf16, #tpu.memory_space<vmem>>, %arg14: memref<1x32xf32, #tpu.memory_space<vmem>>, %arg15: memref<1x32xf32, #tpu.memory_space<vmem>>, %arg16: memref<1x32xf32, #tpu.memory_space<vmem>>, %arg17: memref<1x8x32xbf16, #tpu.memory_space<vmem>>, %arg18: memref<1x4x8x8xbf16, #tpu.memory_space<vmem>>, %arg19: memref<8x32xbf16, #tpu.memory_space<vmem>>) attributes {dimension_semantics = [#tpu.dimension_semantics<parallel>, #tpu.dimension_semantics<arbitrary>], iteration_bounds = array<i64: 2, 1>, scalar_prefetch = 0 : i64, scratch_operands = 1 : i64, tpu.core_type = #tpu.core_type<tc>, window_params = [{transform_indices = @transform_0, window_bounds = array<i64: 1, 8, 32>}, {transform_indices = @transform_1, window_bounds = array<i64: 1, 1, 8>}, {pipeline_mode = #tpu.pipeline_mode<synchronous>, transform_indices = @transform_2, window_bounds = array<i64: 8, 32>}, {pipeline_mode = #tpu.pipeline_mode<synchronous>, transform_indices = @transform_3, window_bounds = array<i64: 32, 96>}, {pipeline_mode = #tpu.pipeline_mode<synchronous>, transform_indices = @transform_4, window_bounds = array<i64: 1, 96>}, {pipeline_mode = #tpu.pipeline_mode<synchronous>, transform_indices = @transform_5, window_bounds = array<i64: 32, 32>}, {pipeline_mode = #tpu.pipeline_mode<synchronous>, transform_indices = @transform_6, window_bounds = array<i64: 1, 32>}, {pipeline_mode = #tpu.pipeline_mode<synchronous>, transform_indices = @transform_7, window_bounds = array<i64: 1, 32>}, {pipeline_mode = #tpu.pipeline_mode<synchronous>, transform_indices = @transform_8, window_bounds = array<i64: 1, 32>}, {pipeline_mode = #tpu.pipeline_mode<synchronous>, transform_indices = @transform_9, window_bounds = array<i64: 32, 64>}, {pipeline_mode = #tpu.pipeline_mode<synchronous>, transform_indices = @transform_10, window_bounds = array<i64: 1, 64>}, {pipeline_mode = #tpu.pipeline_mode<synchronous>, transform_indices = @transform_11, window_bounds = array<i64: 64, 32>}, {pipeline_mode = #tpu.pipeline_mode<synchronous>, transform_indices = @transform_12, window_bounds = array<i64: 1, 32>}, {pipeline_mode = #tpu.pipeline_mode<synchronous>, transform_indices = @transform_13, window_bounds = array<i64: 1, 32>}, {pipeline_mode = #tpu.pipeline_mode<synchronous>, transform_indices = @transform_14, window_bounds = array<i64: 1, 32>}, {transform_indices = @transform_15, window_bounds = array<i64: 1, 8, 32>}, {transform_indices = @transform_16, window_bounds = array<i64: 1, 4, 8, 8>}]} {
    %c0 = arith.constant 0 : index
    %c0_0 = arith.constant 0 : index
    %c0_1 = arith.constant 0 : index
    %0 = vector.load %arg2[%c0, %c0_0, %c0_1] : memref<1x8x32xf32, #tpu.memory_space<vmem>>, vector<1x8x32xf32>
    %1 = vector.shape_cast %0 : vector<1x8x32xf32> to vector<8x32xf32>
    %cst = arith.constant 5.65685415 : f32
    %2 = vector.broadcast %cst : f32 to vector<8x32xf32>
    %3 = arith.mulf %1, %2 : vector<8x32xf32>
    %c0_2 = arith.constant 0 : index
    %c0_3 = arith.constant 0 : index
    %4 = vector.load %arg4[%c0_2, %c0_3] : memref<8x32xf32, #tpu.memory_space<vmem>>, vector<8x32xf32>
    %5 = arith.addf %3, %4 : vector<8x32xf32>
    %6 = arith.truncf %5 : vector<8x32xf32> to vector<8x32xbf16>
    %c0_4 = arith.constant 0 : index
    %c0_5 = arith.constant 0 : index
    %7 = vector.load %arg5[%c0_4, %c0_5] : memref<32x96xbf16, #tpu.memory_space<vmem>>, vector<32x96xbf16>
    %cst_6 = arith.constant dense<0.000000e+00> : vector<8x96xf32>
    %8 = tpu.matmul %6, %7, %cst_6 {dimension_numbers = #tpu.dot_dimension_numbers<[1], [0], [0], [1], [0, 0, 1, 1], [], []>} : vector<8x32xbf16>, vector<32x96xbf16>, vector<8x96xf32> -> vector<8x96xf32>
    %c0_7 = arith.constant 0 : index
    %c0_8 = arith.constant 0 : index
    %9 = vector.load %arg6[%c0_7, %c0_8] : memref<1x96xf32, #tpu.memory_space<vmem>>, vector<1x96xf32>
    %10 = vector.broadcast %9 : vector<1x96xf32> to vector<8x96xf32>
    %11 = arith.addf %8, %10 : vector<8x96xf32>
    %12 = vector.extract_strided_slice %11 {offsets = [0, 0], sizes = [8, 32], strides = [1, 1]} : vector<8x96xf32> to vector<8x32xf32>
    %13 = vector.extract_strided_slice %11 {offsets = [0, 32], sizes = [8, 32], strides = [1, 1]} : vector<8x96xf32> to vector<8x32xf32>
    %14 = arith.truncf %13 : vector<8x32xf32> to vector<8x32xbf16>
    %15 = vector.extract_strided_slice %11 {offsets = [0, 64], sizes = [8, 32], strides = [1, 1]} : vector<8x96xf32> to vector<8x32xf32>
    %16 = arith.truncf %15 : vector<8x32xf32> to vector<8x32xbf16>
    %cst_9 = arith.constant 0.353553385 : f32
    %17 = vector.broadcast %cst_9 : f32 to vector<8x32xf32>
    %18 = arith.mulf %12, %17 : vector<8x32xf32>
    %c0_10 = arith.constant 0 : index
    %c0_11 = arith.constant 0 : index
    %c0_12 = arith.constant 0 : index
    %19 = vector.load %arg3[%c0_10, %c0_11, %c0_12] : memref<1x1x8xf32, #tpu.memory_space<vmem>>, vector<1x1x8xf32>
    %20 = vector.shape_cast %19 : vector<1x1x8xf32> to vector<1x8xf32>
    %cst_13 = arith.constant 0.000000e+00 : f32
    %21 = vector.broadcast %cst_13 : f32 to vector<1x8xf32>
    %22 = arith.cmpf oeq, %20, %21 : vector<1x8xf32>
    %23 = arith.truncf %18 : vector<8x32xf32> to vector<8x32xbf16>
    %24 = vector.extract_strided_slice %23 {offsets = [0, 0], sizes = [8, 8], strides = [1, 1]} : vector<8x32xbf16> to vector<8x8xbf16>
    %25 = vector.extract_strided_slice %14 {offsets = [0, 0], sizes = [8, 8], strides = [1, 1]} : vector<8x32xbf16> to vector<8x8xbf16>
    %cst_14 = arith.constant dense<0.000000e+00> : vector<8x8xf32>
    %26 = tpu.matmul %24, %25, %cst_14 {dimension_numbers = #tpu.dot_dimension_numbers<[1], [1], [0], [0], [0, 0, 1, 0], [], []>} : vector<8x8xbf16>, vector<8x8xbf16>, vector<8x8xf32> -> vector<8x8xf32>
    %cst_15 = arith.constant -1.000000e+10 : f32
    %27 = vector.shape_cast %22 : vector<1x8xi1> to vector<1x8xi1>
    %28 = vector.broadcast %27 : vector<1x8xi1> to vector<8x8xi1>
    %29 = vector.broadcast %cst_15 : f32 to vector<8x8xf32>
    %30 = arith.select %28, %29, %26 : vector<8x8xi1>, vector<8x8xf32>
    %cst_16 = arith.constant dense<0xFF800000> : vector<8xf32>
    %31 = vector.multi_reduction <maximumf>, %30, %cst_16 [1] : vector<8x8xf32> to vector<8xf32>
    %32 = vector.shape_cast %31 : vector<8xf32> to vector<8x1xf32>
    %33 = vector.broadcast %32 : vector<8x1xf32> to vector<8x8xf32>
    %34 = arith.subf %30, %33 : vector<8x8xf32>
    %35 = math.exp %34 : vector<8x8xf32>
    %cst_17 = arith.constant dense<0.000000e+00> : vector<8xf32>
    %36 = vector.multi_reduction <add>, %35, %cst_17 [1] : vector<8x8xf32> to vector<8xf32>
    %37 = vector.shape_cast %36 : vector<8xf32> to vector<8x1xf32>
    %38 = tpu.reciprocal %37 {approx = true} : vector<8x1xf32> -> vector<8x1xf32>
    %39 = vector.broadcast %38 : vector<8x1xf32> to vector<8x8xf32>
    %40 = arith.mulf %35, %39 : vector<8x8xf32>
    %41 = arith.truncf %40 : vector<8x8xf32> to vector<8x8xbf16>
    %c0_18 = arith.constant 0 : index
    %c0_19 = arith.constant 0 : index
    %c0_20 = arith.constant 0 : index
    %c0_21 = arith.constant 0 : index
    %42 = vector.load %arg18[%c0_18, %c0_19, %c0_20, %c0_21] : memref<1x4x8x8xbf16, #tpu.memory_space<vmem>>, vector<1x1x8x8xbf16>
    %43 = vector.shape_cast %42 : vector<1x1x8x8xbf16> to vector<8x8xbf16>
    %44 = vector.shape_cast %41 : vector<8x8xbf16> to vector<1x1x8x8xbf16>
    tpu.vector_store %arg18[%c0_18, %c0_19, %c0_20, %c0_21], %44 {strides = array<i32>} : memref<1x4x8x8xbf16, #tpu.memory_space<vmem>>, vector<1x1x8x8xbf16>,
    %45 = arith.truncf %40 : vector<8x8xf32> to vector<8x8xbf16>
    %46 = vector.extract_strided_slice %16 {offsets = [0, 0], sizes = [8, 8], strides = [1, 1]} : vector<8x32xbf16> to vector<8x8xbf16>
    %cst_22 = arith.constant dense<0.000000e+00> : vector<8x8xf32>
    %47 = tpu.matmul %45, %46, %cst_22 {dimension_numbers = #tpu.dot_dimension_numbers<[1], [0], [0], [1], [0, 0, 1, 1], [], []>} : vector<8x8xbf16>, vector<8x8xbf16>, vector<8x8xf32> -> vector<8x8xf32>
    %48 = arith.truncf %47 : vector<8x8xf32> to vector<8x8xbf16>
    %c0_23 = arith.constant 0 : index
    %c0_24 = arith.constant 0 : index
    %49 = vector.load %arg19[%c0_23, %c0_24] : memref<8x32xbf16, #tpu.memory_space<vmem>>, vector<8x8xbf16>
    tpu.vector_store %arg19[%c0_23, %c0_24], %48 {strides = array<i32>} : memref<8x32xbf16, #tpu.memory_space<vmem>>, vector<8x8xbf16>,
    %50 = vector.extract_strided_slice %23 {offsets = [0, 8], sizes = [8, 8], strides = [1, 1]} : vector<8x32xbf16> to vector<8x8xbf16>
    %51 = vector.extract_strided_slice %14 {offsets = [0, 8], sizes = [8, 8], strides = [1, 1]} : vector<8x32xbf16> to vector<8x8xbf16>
    %cst_25 = arith.constant dense<0.000000e+00> : vector<8x8xf32>
    %52 = tpu.matmul %50, %51, %cst_25 {dimension_numbers = #tpu.dot_dimension_numbers<[1], [1], [0], [0], [0, 0, 1, 0], [], []>} : vector<8x8xbf16>, vector<8x8xbf16>, vector<8x8xf32> -> vector<8x8xf32>
    %cst_26 = arith.constant -1.000000e+10 : f32
    %53 = vector.shape_cast %22 : vector<1x8xi1> to vector<1x8xi1>
    %54 = vector.broadcast %53 : vector<1x8xi1> to vector<8x8xi1>
    %55 = vector.broadcast %cst_26 : f32 to vector<8x8xf32>
    %56 = arith.select %54, %55, %52 : vector<8x8xi1>, vector<8x8xf32>
    %cst_27 = arith.constant dense<0xFF800000> : vector<8xf32>
    %57 = vector.multi_reduction <maximumf>, %56, %cst_27 [1] : vector<8x8xf32> to vector<8xf32>
    %58 = vector.shape_cast %57 : vector<8xf32> to vector<8x1xf32>
    %59 = vector.broadcast %58 : vector<8x1xf32> to vector<8x8xf32>
    %60 = arith.subf %56, %59 : vector<8x8xf32>
    %61 = math.exp %60 : vector<8x8xf32>
    %cst_28 = arith.constant dense<0.000000e+00> : vector<8xf32>
    %62 = vector.multi_reduction <add>, %61, %cst_28 [1] : vector<8x8xf32> to vector<8xf32>
    %63 = vector.shape_cast %62 : vector<8xf32> to vector<8x1xf32>
    %64 = tpu.reciprocal %63 {approx = true} : vector<8x1xf32> -> vector<8x1xf32>
    %65 = vector.broadcast %64 : vector<8x1xf32> to vector<8x8xf32>
    %66 = arith.mulf %61, %65 : vector<8x8xf32>
    %67 = arith.truncf %66 : vector<8x8xf32> to vector<8x8xbf16>
    %c0_29 = arith.constant 0 : index
    %c1 = arith.constant 1 : index
    %c0_30 = arith.constant 0 : index
    %c0_31 = arith.constant 0 : index
    %68 = vector.load %arg18[%c0_29, %c1, %c0_30, %c0_31] : memref<1x4x8x8xbf16, #tpu.memory_space<vmem>>, vector<1x1x8x8xbf16>
    %69 = vector.shape_cast %68 : vector<1x1x8x8xbf16> to vector<8x8xbf16>
    %70 = vector.shape_cast %67 : vector<8x8xbf16> to vector<1x1x8x8xbf16>
    tpu.vector_store %arg18[%c0_29, %c1, %c0_30, %c0_31], %70 {strides = array<i32>} : memref<1x4x8x8xbf16, #tpu.memory_space<vmem>>, vector<1x1x8x8xbf16>,
    %71 = arith.truncf %66 : vector<8x8xf32> to vector<8x8xbf16>
    %72 = vector.extract_strided_slice %16 {offsets = [0, 8], sizes = [8, 8], strides = [1, 1]} : vector<8x32xbf16> to vector<8x8xbf16>
    %cst_32 = arith.constant dense<0.000000e+00> : vector<8x8xf32>
    %73 = tpu.matmul %71, %72, %cst_32 {dimension_numbers = #tpu.dot_dimension_numbers<[1], [0], [0], [1], [0, 0, 1, 1], [], []>} : vector<8x8xbf16>, vector<8x8xbf16>, vector<8x8xf32> -> vector<8x8xf32>
    %74 = arith.truncf %73 : vector<8x8xf32> to vector<8x8xbf16>
    %c0_33 = arith.constant 0 : index
    %c8 = arith.constant 8 : index
    %75 = vector.load %arg19[%c0_33, %c8] : memref<8x32xbf16, #tpu.memory_space<vmem>>, vector<8x8xbf16>
    tpu.vector_store %arg19[%c0_33, %c8], %74 {strides = array<i32>} : memref<8x32xbf16, #tpu.memory_space<vmem>>, vector<8x8xbf16>,
    %76 = vector.extract_strided_slice %23 {offsets = [0, 16], sizes = [8, 8], strides = [1, 1]} : vector<8x32xbf16> to vector<8x8xbf16>
    %77 = vector.extract_strided_slice %14 {offsets = [0, 16], sizes = [8, 8], strides = [1, 1]} : vector<8x32xbf16> to vector<8x8xbf16>
    %cst_34 = arith.constant dense<0.000000e+00> : vector<8x8xf32>
    %78 = tpu.matmul %76, %77, %cst_34 {dimension_numbers = #tpu.dot_dimension_numbers<[1], [1], [0], [0], [0, 0, 1, 0], [], []>} : vector<8x8xbf16>, vector<8x8xbf16>, vector<8x8xf32> -> vector<8x8xf32>
    %cst_35 = arith.constant -1.000000e+10 : f32
    %79 = vector.shape_cast %22 : vector<1x8xi1> to vector<1x8xi1>
    %80 = vector.broadcast %79 : vector<1x8xi1> to vector<8x8xi1>
    %81 = vector.broadcast %cst_35 : f32 to vector<8x8xf32>
    %82 = arith.select %80, %81, %78 : vector<8x8xi1>, vector<8x8xf32>
    %cst_36 = arith.constant dense<0xFF800000> : vector<8xf32>
    %83 = vector.multi_reduction <maximumf>, %82, %cst_36 [1] : vector<8x8xf32> to vector<8xf32>
    %84 = vector.shape_cast %83 : vector<8xf32> to vector<8x1xf32>
    %85 = vector.broadcast %84 : vector<8x1xf32> to vector<8x8xf32>
    %86 = arith.subf %82, %85 : vector<8x8xf32>
    %87 = math.exp %86 : vector<8x8xf32>
    %cst_37 = arith.constant dense<0.000000e+00> : vector<8xf32>
    %88 = vector.multi_reduction <add>, %87, %cst_37 [1] : vector<8x8xf32> to vector<8xf32>
    %89 = vector.shape_cast %88 : vector<8xf32> to vector<8x1xf32>
    %90 = tpu.reciprocal %89 {approx = true} : vector<8x1xf32> -> vector<8x1xf32>
    %91 = vector.broadcast %90 : vector<8x1xf32> to vector<8x8xf32>
    %92 = arith.mulf %87, %91 : vector<8x8xf32>
    %93 = arith.truncf %92 : vector<8x8xf32> to vector<8x8xbf16>
    %c0_38 = arith.constant 0 : index
    %c2 = arith.constant 2 : index
    %c0_39 = arith.constant 0 : index
    %c0_40 = arith.constant 0 : index
    %94 = vector.load %arg18[%c0_38, %c2, %c0_39, %c0_40] : memref<1x4x8x8xbf16, #tpu.memory_space<vmem>>, vector<1x1x8x8xbf16>
    %95 = vector.shape_cast %94 : vector<1x1x8x8xbf16> to vector<8x8xbf16>
    %96 = vector.shape_cast %93 : vector<8x8xbf16> to vector<1x1x8x8xbf16>
    tpu.vector_store %arg18[%c0_38, %c2, %c0_39, %c0_40], %96 {strides = array<i32>} : memref<1x4x8x8xbf16, #tpu.memory_space<vmem>>, vector<1x1x8x8xbf16>,
    %97 = arith.truncf %92 : vector<8x8xf32> to vector<8x8xbf16>
    %98 = vector.extract_strided_slice %16 {offsets = [0, 16], sizes = [8, 8], strides = [1, 1]} : vector<8x32xbf16> to vector<8x8xbf16>
    %cst_41 = arith.constant dense<0.000000e+00> : vector<8x8xf32>
    %99 = tpu.matmul %97, %98, %cst_41 {dimension_numbers = #tpu.dot_dimension_numbers<[1], [0], [0], [1], [0, 0, 1, 1], [], []>} : vector<8x8xbf16>, vector<8x8xbf16>, vector<8x8xf32> -> vector<8x8xf32>
    %100 = arith.truncf %99 : vector<8x8xf32> to vector<8x8xbf16>
    %c0_42 = arith.constant 0 : index
    %c16 = arith.constant 16 : index
    %101 = vector.load %arg19[%c0_42, %c16] : memref<8x32xbf16, #tpu.memory_space<vmem>>, vector<8x8xbf16>
    tpu.vector_store %arg19[%c0_42, %c16], %100 {strides = array<i32>} : memref<8x32xbf16, #tpu.memory_space<vmem>>, vector<8x8xbf16>,
    %102 = vector.extract_strided_slice %23 {offsets = [0, 24], sizes = [8, 8], strides = [1, 1]} : vector<8x32xbf16> to vector<8x8xbf16>
    %103 = vector.extract_strided_slice %14 {offsets = [0, 24], sizes = [8, 8], strides = [1, 1]} : vector<8x32xbf16> to vector<8x8xbf16>
    %cst_43 = arith.constant dense<0.000000e+00> : vector<8x8xf32>
    %104 = tpu.matmul %102, %103, %cst_43 {dimension_numbers = #tpu.dot_dimension_numbers<[1], [1], [0], [0], [0, 0, 1, 0], [], []>} : vector<8x8xbf16>, vector<8x8xbf16>, vector<8x8xf32> -> vector<8x8xf32>
    %cst_44 = arith.constant -1.000000e+10 : f32
    %105 = vector.shape_cast %22 : vector<1x8xi1> to vector<1x8xi1>
    %106 = vector.broadcast %105 : vector<1x8xi1> to vector<8x8xi1>
    %107 = vector.broadcast %cst_44 : f32 to vector<8x8xf32>
    %108 = arith.select %106, %107, %104 : vector<8x8xi1>, vector<8x8xf32>
    %cst_45 = arith.constant dense<0xFF800000> : vector<8xf32>
    %109 = vector.multi_reduction <maximumf>, %108, %cst_45 [1] : vector<8x8xf32> to vector<8xf32>
    %110 = vector.shape_cast %109 : vector<8xf32> to vector<8x1xf32>
    %111 = vector.broadcast %110 : vector<8x1xf32> to vector<8x8xf32>
    %112 = arith.subf %108, %111 : vector<8x8xf32>
    %113 = math.exp %112 : vector<8x8xf32>
    %cst_46 = arith.constant dense<0.000000e+00> : vector<8xf32>
    %114 = vector.multi_reduction <add>, %113, %cst_46 [1] : vector<8x8xf32> to vector<8xf32>
    %115 = vector.shape_cast %114 : vector<8xf32> to vector<8x1xf32>
    %116 = tpu.reciprocal %115 {approx = true} : vector<8x1xf32> -> vector<8x1xf32>
    %117 = vector.broadcast %116 : vector<8x1xf32> to vector<8x8xf32>
    %118 = arith.mulf %113, %117 : vector<8x8xf32>
    %119 = arith.truncf %118 : vector<8x8xf32> to vector<8x8xbf16>
    %c0_47 = arith.constant 0 : index
    %c3 = arith.constant 3 : index
    %c0_48 = arith.constant 0 : index
    %c0_49 = arith.constant 0 : index
    %120 = vector.load %arg18[%c0_47, %c3, %c0_48, %c0_49] : memref<1x4x8x8xbf16, #tpu.memory_space<vmem>>, vector<1x1x8x8xbf16>
    %121 = vector.shape_cast %120 : vector<1x1x8x8xbf16> to vector<8x8xbf16>
    %122 = vector.shape_cast %119 : vector<8x8xbf16> to vector<1x1x8x8xbf16>
    tpu.vector_store %arg18[%c0_47, %c3, %c0_48, %c0_49], %122 {strides = array<i32>} : memref<1x4x8x8xbf16, #tpu.memory_space<vmem>>, vector<1x1x8x8xbf16>,
    %123 = arith.truncf %118 : vector<8x8xf32> to vector<8x8xbf16>
    %124 = vector.extract_strided_slice %16 {offsets = [0, 24], sizes = [8, 8], strides = [1, 1]} : vector<8x32xbf16> to vector<8x8xbf16>
    %cst_50 = arith.constant dense<0.000000e+00> : vector<8x8xf32>
    %125 = tpu.matmul %123, %124, %cst_50 {dimension_numbers = #tpu.dot_dimension_numbers<[1], [0], [0], [1], [0, 0, 1, 1], [], []>} : vector<8x8xbf16>, vector<8x8xbf16>, vector<8x8xf32> -> vector<8x8xf32>
    %126 = arith.truncf %125 : vector<8x8xf32> to vector<8x8xbf16>
    %c0_51 = arith.constant 0 : index
    %c24 = arith.constant 24 : index
    %127 = vector.load %arg19[%c0_51, %c24] : memref<8x32xbf16, #tpu.memory_space<vmem>>, vector<8x8xbf16>
    tpu.vector_store %arg19[%c0_51, %c24], %126 {strides = array<i32>} : memref<8x32xbf16, #tpu.memory_space<vmem>>, vector<8x8xbf16>,
    %c0_52 = arith.constant 0 : index
    %c0_53 = arith.constant 0 : index
    %128 = vector.load %arg19[%c0_52, %c0_53] : memref<8x32xbf16, #tpu.memory_space<vmem>>, vector<8x32xbf16>
    %c0_54 = arith.constant 0 : index
    %c0_55 = arith.constant 0 : index
    %129 = vector.load %arg7[%c0_54, %c0_55] : memref<32x32xbf16, #tpu.memory_space<vmem>>, vector<32x32xbf16>
    %cst_56 = arith.constant dense<0.000000e+00> : vector<8x32xf32>
    %130 = tpu.matmul %128, %129, %cst_56 {dimension_numbers = #tpu.dot_dimension_numbers<[1], [0], [0], [1], [0, 0, 1, 1], [], []>} : vector<8x32xbf16>, vector<32x32xbf16>, vector<8x32xf32> -> vector<8x32xf32>
    %c0_57 = arith.constant 0 : index
    %c0_58 = arith.constant 0 : index
    %131 = vector.load %arg8[%c0_57, %c0_58] : memref<1x32xf32, #tpu.memory_space<vmem>>, vector<1x32xf32>
    %132 = vector.broadcast %131 : vector<1x32xf32> to vector<8x32xf32>
    %133 = arith.addf %130, %132 : vector<8x32xf32>
    %134 = arith.addf %5, %133 : vector<8x32xf32>
    %c0_59 = arith.constant 0 : index
    %c0_60 = arith.constant 0 : index
    %135 = vector.load %arg9[%c0_59, %c0_60] : memref<1x32xf32, #tpu.memory_space<vmem>>, vector<1x32xf32>
    %c0_61 = arith.constant 0 : index
    %c0_62 = arith.constant 0 : index
    %136 = vector.load %arg10[%c0_61, %c0_62] : memref<1x32xf32, #tpu.memory_space<vmem>>, vector<1x32xf32>
    %cst_63 = arith.constant dense<0.000000e+00> : vector<8xf32>
    %137 = vector.multi_reduction <add>, %134, %cst_63 [1] : vector<8x32xf32> to vector<8xf32>
    %138 = vector.shape_cast %137 : vector<8xf32> to vector<8x1xf32>
    %cst_64 = arith.constant 3.200000e+01 : f32
    %139 = vector.broadcast %cst_64 : f32 to vector<8x1xf32>
    %140 = arith.divf %138, %139 : vector<8x1xf32>
    %141 = vector.broadcast %140 : vector<8x1xf32> to vector<8x32xf32>
    %142 = arith.subf %134, %141 : vector<8x32xf32>
    %143 = arith.mulf %142, %142 : vector<8x32xf32>
    %cst_65 = arith.constant dense<0.000000e+00> : vector<8xf32>
    %144 = vector.multi_reduction <add>, %143, %cst_65 [1] : vector<8x32xf32> to vector<8xf32>
    %145 = vector.shape_cast %144 : vector<8xf32> to vector<8x1xf32>
    %cst_66 = arith.constant 3.200000e+01 : f32
    %146 = vector.broadcast %cst_66 : f32 to vector<8x1xf32>
    %147 = arith.divf %145, %146 : vector<8x1xf32>
    %148 = vector.broadcast %140 : vector<8x1xf32> to vector<8x32xf32>
    %149 = arith.subf %134, %148 : vector<8x32xf32>
    %cst_67 = arith.constant 9.99999974E-6 : f32
    %150 = vector.broadcast %cst_67 : f32 to vector<8x1xf32>
    %151 = arith.addf %147, %150 : vector<8x1xf32>
    %152 = math.rsqrt %151 : vector<8x1xf32>
    %153 = vector.broadcast %152 : vector<8x1xf32> to vector<8x32xf32>
    %154 = arith.mulf %149, %153 : vector<8x32xf32>
    %155 = vector.broadcast %135 : vector<1x32xf32> to vector<8x32xf32>
    %156 = arith.mulf %154, %155 : vector<8x32xf32>
    %157 = vector.broadcast %136 : vector<1x32xf32> to vector<8x32xf32>
    %158 = arith.addf %156, %157 : vector<8x32xf32>
    %159 = arith.truncf %158 : vector<8x32xf32> to vector<8x32xbf16>
    %c0_68 = arith.constant 0 : index
    %c0_69 = arith.constant 0 : index
    %160 = vector.load %arg11[%c0_68, %c0_69] : memref<32x64xbf16, #tpu.memory_space<vmem>>, vector<32x64xbf16>
    %cst_70 = arith.constant dense<0.000000e+00> : vector<8x64xf32>
    %161 = tpu.matmul %159, %160, %cst_70 {dimension_numbers = #tpu.dot_dimension_numbers<[1], [0], [0], [1], [0, 0, 1, 1], [], []>} : vector<8x32xbf16>, vector<32x64xbf16>, vector<8x64xf32> -> vector<8x64xf32>
    %c0_71 = arith.constant 0 : index
    %c0_72 = arith.constant 0 : index
    %162 = vector.load %arg12[%c0_71, %c0_72] : memref<1x64xf32, #tpu.memory_space<vmem>>, vector<1x64xf32>
    %163 = vector.broadcast %162 : vector<1x64xf32> to vector<8x64xf32>
    %164 = arith.addf %161, %163 : vector<8x64xf32>
    %cst_73 = arith.constant 0.000000e+00 : f32
    %165 = vector.broadcast %cst_73 : f32 to vector<8x64xf32>
    %166 = arith.maximumf %164, %165 : vector<8x64xf32>
    %167 = arith.truncf %166 : vector<8x64xf32> to vector<8x64xbf16>
    %c0_74 = arith.constant 0 : index
    %c0_75 = arith.constant 0 : index
    %168 = vector.load %arg13[%c0_74, %c0_75] : memref<64x32xbf16, #tpu.memory_space<vmem>>, vector<64x32xbf16>
    %cst_76 = arith.constant dense<0.000000e+00> : vector<8x32xf32>
    %169 = tpu.matmul %167, %168, %cst_76 {dimension_numbers = #tpu.dot_dimension_numbers<[1], [0], [0], [1], [0, 0, 1, 1], [], []>} : vector<8x64xbf16>, vector<64x32xbf16>, vector<8x32xf32> -> vector<8x32xf32>
    %c0_77 = arith.constant 0 : index
    %c0_78 = arith.constant 0 : index
    %170 = vector.load %arg14[%c0_77, %c0_78] : memref<1x32xf32, #tpu.memory_space<vmem>>, vector<1x32xf32>
    %171 = vector.broadcast %170 : vector<1x32xf32> to vector<8x32xf32>
    %172 = arith.addf %169, %171 : vector<8x32xf32>
    %173 = arith.addf %158, %172 : vector<8x32xf32>
    %c0_79 = arith.constant 0 : index
    %c0_80 = arith.constant 0 : index
    %174 = vector.load %arg15[%c0_79, %c0_80] : memref<1x32xf32, #tpu.memory_space<vmem>>, vector<1x32xf32>
    %c0_81 = arith.constant 0 : index
    %c0_82 = arith.constant 0 : index
    %175 = vector.load %arg16[%c0_81, %c0_82] : memref<1x32xf32, #tpu.memory_space<vmem>>, vector<1x32xf32>
    %cst_83 = arith.constant dense<0.000000e+00> : vector<8xf32>
    %176 = vector.multi_reduction <add>, %173, %cst_83 [1] : vector<8x32xf32> to vector<8xf32>
    %177 = vector.shape_cast %176 : vector<8xf32> to vector<8x1xf32>
    %cst_84 = arith.constant 3.200000e+01 : f32
    %178 = vector.broadcast %cst_84 : f32 to vector<8x1xf32>
    %179 = arith.divf %177, %178 : vector<8x1xf32>
    %180 = vector.broadcast %179 : vector<8x1xf32> to vector<8x32xf32>
    %181 = arith.subf %173, %180 : vector<8x32xf32>
    %182 = arith.mulf %181, %181 : vector<8x32xf32>
    %cst_85 = arith.constant dense<0.000000e+00> : vector<8xf32>
    %183 = vector.multi_reduction <add>, %182, %cst_85 [1] : vector<8x32xf32> to vector<8xf32>
    %184 = vector.shape_cast %183 : vector<8xf32> to vector<8x1xf32>
    %cst_86 = arith.constant 3.200000e+01 : f32
    %185 = vector.broadcast %cst_86 : f32 to vector<8x1xf32>
    %186 = arith.divf %184, %185 : vector<8x1xf32>
    %187 = vector.broadcast %179 : vector<8x1xf32> to vector<8x32xf32>
    %188 = arith.subf %173, %187 : vector<8x32xf32>
    %cst_87 = arith.constant 9.99999974E-6 : f32
    %189 = vector.broadcast %cst_87 : f32 to vector<8x1xf32>
    %190 = arith.addf %186, %189 : vector<8x1xf32>
    %191 = math.rsqrt %190 : vector<8x1xf32>
    %192 = vector.broadcast %191 : vector<8x1xf32> to vector<8x32xf32>
    %193 = arith.mulf %188, %192 : vector<8x32xf32>
    %194 = vector.broadcast %174 : vector<1x32xf32> to vector<8x32xf32>
    %195 = arith.mulf %193, %194 : vector<8x32xf32>
    %196 = vector.broadcast %175 : vector<1x32xf32> to vector<8x32xf32>
    %197 = arith.addf %195, %196 : vector<8x32xf32>
    %198 = arith.truncf %197 : vector<8x32xf32> to vector<8x32xbf16>
    %c0_88 = arith.constant 0 : index
    %c0_89 = arith.constant 0 : index
    %c0_90 = arith.constant 0 : index
    %199 = vector.load %arg17[%c0_88, %c0_89, %c0_90] : memref<1x8x32xbf16, #tpu.memory_space<vmem>>, vector<1x8x32xbf16>
    %200 = vector.shape_cast %199 : vector<1x8x32xbf16> to vector<8x32xbf16>
    %201 = vector.shape_cast %198 : vector<8x32xbf16> to vector<1x8x32xbf16>
    tpu.vector_store %arg17[%c0_88, %c0_89, %c0_90], %201 {strides = array<i32>} : memref<1x8x32xbf16, #tpu.memory_space<vmem>>, vector<1x8x32xbf16>,
    return
  }
  func.func @transform_0(%arg0: i32, %arg1: i32) -> (i32, i32, i32) {
    %c0_i32 = arith.constant 0 : i32
    %c0_i32_0 = arith.constant 0 : i32
    %c0_i32_1 = arith.constant 0 : i32
    return %arg0, %c0_i32, %c0_i32_0 : i32, i32, i32
  }
  func.func @transform_1(%arg0: i32, %arg1: i32) -> (i32, i32, i32) {
    %c0_i32 = arith.constant 0 : i32
    %c0_i32_0 = arith.constant 0 : i32
    %c0_i32_1 = arith.constant 0 : i32
    return %arg0, %c0_i32, %c0_i32_0 : i32, i32, i32
  }
  func.func @transform_2(%arg0: i32, %arg1: i32) -> (i32, i32) {
    %c0_i32 = arith.constant 0 : i32
    %c0_i32_0 = arith.constant 0 : i32
    %c0_i32_1 = arith.constant 0 : i32
    return %c0_i32, %c0_i32_0 : i32, i32
  }
  func.func @transform_3(%arg0: i32, %arg1: i32) -> (i32, i32) {
    %c0_i32 = arith.constant 0 : i32
    %c0_i32_0 = arith.constant 0 : i32
    %c0_i32_1 = arith.constant 0 : i32
    return %c0_i32, %c0_i32_0 : i32, i32
  }
  func.func @transform_4(%arg0: i32, %arg1: i32) -> (i32, i32) {
    %c0_i32 = arith.constant 0 : i32
    %c0_i32_0 = arith.constant 0 : i32
    %c0_i32_1 = arith.constant 0 : i32
    return %c0_i32, %c0_i32_0 : i32, i32
  }
  func.func @transform_5(%arg0: i32, %arg1: i32) -> (i32, i32) {
    %c0_i32 = arith.constant 0 : i32
    %c0_i32_0 = arith.constant 0 : i32
    %c0_i32_1 = arith.constant 0 : i32
    return %c0_i32, %c0_i32_0 : i32, i32
  }
  func.func @transform_6(%arg0: i32, %arg1: i32) -> (i32, i32) {
    %c0_i32 = arith.constant 0 : i32
    %c0_i32_0 = arith.constant 0 : i32
    %c0_i32_1 = arith.constant 0 : i32
    return %c0_i32, %c0_i32_0 : i32, i32
  }
  func.func @transform_7(%arg0: i32, %arg1: i32) -> (i32, i32) {
    %c0_i32 = arith.constant 0 : i32
    %c0_i32_0 = arith.constant 0 : i32
    %c0_i32_1 = arith.constant 0 : i32
    return %c0_i32, %c0_i32_0 : i32, i32
  }
  func.func @transform_8(%arg0: i32, %arg1: i32) -> (i32, i32) {
    %c0_i32 = arith.constant 0 : i32
    %c0_i32_0 = arith.constant 0 : i32
    %c0_i32_1 = arith.constant 0 : i32
    return %c0_i32, %c0_i32_0 : i32, i32
  }
  func.func @transform_9(%arg0: i32, %arg1: i32) -> (i32, i32) {
    %c0_i32 = arith.constant 0 : i32
    %c0_i32_0 = arith.constant 0 : i32
    %c0_i32_1 = arith.constant 0 : i32
    return %c0_i32, %c0_i32_0 : i32, i32
  }
  func.func @transform_10(%arg0: i32, %arg1: i32) -> (i32, i32) {
    %c0_i32 = arith.constant 0 : i32
    %c0_i32_0 = arith.constant 0 : i32
    %c0_i32_1 = arith.constant 0 : i32
    return %c0_i32, %c0_i32_0 : i32, i32
  }
  func.func @transform_11(%arg0: i32, %arg1: i32) -> (i32, i32) {
    %c0_i32 = arith.constant 0 : i32
    %c0_i32_0 = arith.constant 0 : i32
    %c0_i32_1 = arith.constant 0 : i32
    return %c0_i32, %c0_i32_0 : i32, i32
  }
  func.func @transform_12(%arg0: i32, %arg1: i32) -> (i32, i32) {
    %c0_i32 = arith.constant 0 : i32
    %c0_i32_0 = arith.constant 0 : i32
    %c0_i32_1 = arith.constant 0 : i32
    return %c0_i32, %c0_i32_0 : i32, i32
  }
  func.func @transform_13(%arg0: i32, %arg1: i32) -> (i32, i32) {
    %c0_i32 = arith.constant 0 : i32
    %c0_i32_0 = arith.constant 0 : i32
    %c0_i32_1 = arith.constant 0 : i32
    return %c0_i32, %c0_i32_0 : i32, i32
  }
  func.func @transform_14(%arg0: i32, %arg1: i32) -> (i32, i32) {
    %c0_i32 = arith.constant 0 : i32
    %c0_i32_0 = arith.constant 0 : i32
    %c0_i32_1 = arith.constant 0 : i32
    return %c0_i32, %c0_i32_0 : i32, i32
  }
  func.func @transform_15(%arg0: i32, %arg1: i32) -> (i32, i32, i32) {
    %c0_i32 = arith.constant 0 : i32
    %c0_i32_0 = arith.constant 0 : i32
    return %arg0, %arg1, %c0_i32 : i32, i32, i32
  }
  func.func @transform_16(%arg0: i32, %arg1: i32) -> (i32, i32, i32, i32) {
    %c0_i32 = arith.constant 0 : i32
    %c0_i32_0 = arith.constant 0 : i32
    %c0_i32_1 = arith.constant 0 : i32
    return %arg0, %c0_i32, %arg1, %c0_i32_0 : i32, i32, i32, i32
  }
}

</mosaic_0001>

<bundles_post_ra>
// kernel: tpu_custom_call.1
= control target key start
LH: loop header
LB: loop body
LE: loop exit
PB: predicated region body
PF: predicated region fallthrough
CT: control target
= control target key end

     0   :  { %s2145_s0 = inlined_call_operand.vmem [shape: f32[2,8,32], index: 0, kind: input, shape index: {}]   ;;  %s2146_s1 = inlined_call_operand.hbm [shape: f32[2,1,8], index: 1, kind: input, shape index: {}]   ;;  %s2147_s2 = inlined_call_operand.hbm [shape: f32[8,32], index: 2, kind: input, shape index: {}]   ;;  %s2148_s3 = inlined_call_operand.vmem [shape: bf16[32,96], index: 3, kind: input, shape index: {}]   ;;  %s2149_s4 = inlined_call_operand.vmem [shape: f32[1,96], index: 4, kind: input, shape index: {}]   ;;  %s2150_s5 = inlined_call_operand.vmem [shape: bf16[32,32], index: 5, kind: input, shape index: {}]   ;;  %s2151_s6 = inlined_call_operand.vmem [shape: f32[1,32], index: 6, kind: input, shape index: {}]   ;;  %s2152_s7 = inlined_call_operand.vmem [shape: f32[1,32], index: 7, kind: input, shape index: {}]   ;;  %s2153_s8 = inlined_call_operand.vmem [shape: f32[1,32], index: 8, kind: input, shape index: {}]   ;;  %s2154_s9 = inlined_call_operand.hbm [shape: bf16[32,64], index: 9, kind: input, shape index: {}]   ;;  %s2155_s10 = inlined_call_operand.vmem [shape: f32[1,64], index: 10, kind: input, shape index: {}]   ;;  %s2156_s11 = inlined_call_operand.vmem [shape: bf16[64,32], index: 11, kind: input, shape index: {}]   ;;  %s2157_s12 = inlined_call_operand.vmem [shape: f32[1,32], index: 12, kind: input, shape index: {}]   ;;  %s2158_s13 = inlined_call_operand.vmem [shape: f32[1,32], index: 13, kind: input, shape index: {}]   ;;  %s2159_s14 = inlined_call_operand.vmem [shape: f32[1,32], index: 14, kind: input, shape index: {}]   ;;  %s2160_s15 = inlined_call_operand.hbm [shape: bf16[2,8,32], index: 15, kind: output, shape index: {0}]   ;;  %s2161_s16 = inlined_call_operand.hbm [shape: bf16[2,4,8,8], index: 16, kind: output, shape index: {1}]  }
   0x1   :  { %2168 = sst [smem:[#allocation18_spill]] %s2145_s0 }
   0x2   :  { %2169 = sst [smem:[#allocation19_spill]] %s2146_s1 }
   0x3   :  { %2170 = sst [smem:[#allocation20_spill]] %s2147_s2 }
   0x4   :  { %2171 = sst [smem:[#allocation21_spill]] %s2148_s3 }
   0x5   :  { %2172 = sst [smem:[#allocation22_spill]] %s2149_s4 }
   0x6   :  { %2173 = sst [smem:[#allocation23_spill]] %s2150_s5 }
   0x7   :  { %2174 = sst [smem:[#allocation24_spill]] %s2154_s9 }
   0x8   :  { %2175 = sst [smem:[#allocation25_spill]] %s2158_s13 }
   0x9   :  { %2176 = sst [smem:[#allocation26_spill]] %s2159_s14 }
   0xa   :  { %2177 = sst [smem:[#allocation27_spill]] %s2160_s15 }
   0xb   :  { %2178 = sst [smem:[#allocation28_spill]] %s2161_s16 }
   0xc   :  { %22 = vsyncpa [#allocation4], 0 }
   0xd   :  { %24 = vsyncpa [#allocation4 + $0x1], 0 }
   0xe   :  { %25 = vsyncpa [#allocation7], 0 }
   0xf   :  { %26 = vsyncpa [#allocation5], 0 }
  0x10   :  { %28 = vsyncpa [#allocation5 + $0x1], 0 }
  0x11   :  { %29 = vsyncpa [#allocation11], 0 }
  0x12   :  { %31 = vsyncpa [#allocation11 + $0x1], 0  ;;  %s1850_s21 = smov 0   ;;  %s1852_s22 = smov 0  }
  0x13   :  { %s1854_s23 = smov 0   ;;  %s1856_s24 = smov 0  }
  0x14   :  { %s1858_s25 = smov 0   ;;  %s1860_s26 = smov 0  }
  0x15 LB: > { %2179 = sst [smem:[#allocation16_spill]] %s1722_s21  ;;  %s2162_s27 = sadd.s32 4294967295, %s1742_s26   ;;  %s1742_s26 = sphi %s1860_s26, %s37_s26   ;;  %s1738_s25 = sphi %s1858_s25, %s2207_s25   ;;  %s1734_s24 = sphi %s1856_s24, %s2206_s24   ;;  %s1730_s23 = sphi %s1854_s23, %s2205_s23   ;;  %s1726_s22 = sphi %s1852_s22, %s2204_s22   ;;  %s1722_s21 = sphi %s1850_s21, %s2203_s21  }
  0x16   : > { %s1313_s28 = sadd.s32 4294967294, %s1742_s26   ;;  %p95_p0 = scmp.ne.s32.totalorder %s1726_s22, %s1722_s21 }
  0x17   : > { %p1886_p1 = scmp.eq.s32.totalorder %s2162_s27, 0  ;;  %p400_p2 = scmp.eq.s32.totalorder %s1313_s28, 1 }
  0x18   : > { %p1314_p4 = scmp.ge.s32.totalorder %s1742_s26, 1  ;;  %p435_p6 = scmp.lt.s32.totalorder %s1742_s26, 3 }
  0x19   : > { %p1892_p3 = por %p1886_p1, %p95_p0  ;;  %p1897_p5 = por %p400_p2, %p95_p0 }
  0x1a   : > { %s2184_s2 = sld [smem:[#allocation20_spill]]  ;;  %p1905_p7 = pnand %p1314_p4, %p435_p6 }
  0x1b   : > { %s2182_s0 = scalar_select %p1897_p5, 1, 0 }
  0x1c   : > { %p1317_p8 = scmp.ge.s32.totalorder %s1742_s26, 2  ;;  %p1411_p9 = pneg %p1905_p7 }
  0x1d   : > { %2183 = sst [smem:[#allocation17_spill]] %s2182_s0  ;;  %s1744_s28 = smov [#allocation6]  }
  0x1e   : > { %s449_s27 = sshll.u32 %s1744_s28, 4  ;;  %s2186_s9 = sld [smem:[#allocation24_spill]]  ;;  %s450_s27 = int_to_ptr.vmem [resolvable:$true] %s449_s27 }
  0x1f   : > { %p1412_p10 = pnand %p1411_p9, %p1886_p1  ;;  %s1746_s15 = smov 64  }
  0x20   : > { %s447_s19 = sshll.u32 %s2184_s2, 4  ;;  %s1745_s2 = smov [#allocation8]   ;;  %s448_s19 = int_to_ptr.hbm [resolvable:$true] %s447_s19 }
  0x21   : > { %s478_s21 = sshll.u32 %s1745_s2, 4  ;;  %s1747_s28 = smov 4   ;;  %s479_s21 = int_to_ptr.vmem [resolvable:$true] %s478_s21 }
  0x22   : > { %1414 = dma.hbm_to_vmem [thread:$0]  (!%p1412_p10), %s448_s19, 128, %s450_s27, [#allocation7]  }
  0x23   : > { %s2187_s14 = sadd.s32 4294967295, %s1742_s26   ;;  %s49_s0 = sadd.s32 1, %s1738_s25 }
  0x24   : > { %s476_s18 = sshll.u32 %s2186_s9, 4  ;;  %p394_p11 = scmp.eq.s32.totalorder %s2187_s14, 1  ;;  %s477_s18 = int_to_ptr.hbm [resolvable:$true] %s476_s18 }
  0x25   : > { %1417 = dma.hbm_to_vmem [thread:$0]  (!%p1412_p10), %s477_s18, 256, %s479_s21, [#allocation7], %s1746_s15, %s1746_s15, %s1747_s28  }
  0x26   : > { %p51_p12 = scmp.ge.s32.totalorder %s49_s0, 2  ;;  %s82_s17 = sadd.s32 1, %s1730_s23 }
  0x27   : > { %p89_p13 = scmp.ne.s32.totalorder %s1730_s23, %s1726_s22  ;;  %p90_p0 = scmp.eq.s32.totalorder %s1742_s26, 0 }
  0x28   : > { %s2209_s0 = smov (%p51_p12, %s49_s0), 0  ;;  %p1431_p4 = scmp.lt.s32.totalorder %s1742_s26, 2 }
  0x29   : > { %p1926_p2 = por %p394_p11, %p89_p13  ;;  %s79_s27 = ssub.s32 %s1738_s25, %s2209_s0 }
  0x2a   : > { %s514_s19 = sand.u32 1, %s1730_s23   ;;  %p80_p6 = scmp.eq.s32.totalorder %s79_s27, 0 }
  0x2b   : > { %p91_p9 = por %p90_p0, %p89_p13  ;;  %s2189_s1 = sld [smem:[#allocation19_spill]] }
  0x2c   : > { %s1939_s18 = scalar_select %p80_p6, %s1730_s23, %s82_s17  }
  0x2d   : > { %s517_s9 = scalar_lea.vmem [#allocation3], %s514_s19  ;;  %p1419_p10 = pnand %p1431_p4, %p91_p9 }
  0x2e   : > { %s524_s13 = sshll.u32 %s517_s9, 4  ;;  %s515_s16 = scalar_lea.sflag [#allocation4], %s514_s19  ;;  %s525_s13 = int_to_ptr.vmem [resolvable:$true] %s524_s13 }
  0x2f   : > { %533 = sbr.rel (%p1905_p7) target bundleno = 1954 (0x7a2), region = 80  ;;  %s1944_s27 = sand.u32 (!%p1905_p7), 1, %s1726_s22  }
  0x30   : > { %s536_s15 = scalar_lea.sflag (!%p1905_p7), [#allocation4], %s1944_s27  ;;  %s538_s17 = scalar_lea.vmem (!%p1905_p7), [#allocation3], %s1944_s27 }
  0x31   : > { %s520_s14 = scalar_lea.hbm %s2189_s1, %s1738_s25 }
  0x32   : > { %s522_s28 = sshll.u32 %s520_s14, 4  ;;  %s523_s28 = int_to_ptr.hbm [resolvable:$true] %s522_s28 }
  0x33   : > { %1421 = dma.hbm_to_vmem [thread:$0]  (!%p1419_p10), %s523_s28, 16, %s525_s13, %s515_s16  }
  0x34   : > { %1705 = dma.done.wait (%p1892_p3), %s536_s15, 16  }
  0x35   : > { %1707 = vsyncadd (%p1892_p3), %s536_s15, 4294967280 }
  0x36   : > { %1709 = dma.done.wait (%p1886_p1), [#allocation7], 384  }
  0x37   : > { %1711 = vsyncadd (%p1886_p1), [#allocation7], 4294966912  ;;  %p606_p7 = scmp.lt.s32.totalorder %s1734_s24, 1  ;;  %s2190_s19 = sld [smem:[#allocation18_spill]]  ;;  %v613_v3 = vld [vmem:[#allocation6] sm:$0xff]  ;;  %vm636_vm0 = vcmask 261120  }
  0x38   : > { %s2191_s3 = sld [smem:[#allocation21_spill]]  ;;  %s1749_s16 = smov 104   ;;  %vm663_vm1 = vcmask 64512   ;;  %v655_v29 = vld [vmem:[%s538_s17] sm:$0x1]  ;;  %v1755_v30 = vmov 0  }
  0x39   : > { %s607_s9 = scalar_select %p606_p7, %s1734_s24, 1  ;;  %vm656_vm2 = vcmp.eq.f32.partialorder %v655_v29, 0.0  ;;  %vm706_vm4 = vcmask 1043456   ;;  %vm699_vm5 = vcmask 60416   ;;  %vm792_vm6 = vcmask 126016  }
  0x3a   : > { %s2192_s4 = sld [smem:[#allocation22_spill]]  ;;  %s1750_s20 = smov 120   ;;  %v683_v31 = vsel %vm656_vm2, 1, %v1755_v30  ;;  %vm858_vm7 = vcmask 191616   ;;  %vm924_vm8 = vcmask 257216   ;;  %vm1078_vm13 = vcmask 523264  }
  0x3b   : > { %s1323_s13 = sshll.u32 %s607_s9, 3  ;;  %s1753_s14 = smov 72   ;;  %v684_v32 = vperm.slane %v683_v31, 0 }
  0x3c   : > { %s1754_s28 = smov 112   ;;  %s2167_s17 = smov 64  }
  0x3d   : > { %s609_s21 = scalar_lea.vmem %s2190_s19, %s1323_s13  ;;  %s1748_s13 = smov 96   ;;  %vm1991_vm3 = vcmp.eq.s32.totalorder %v684_v32, 1 }
  0x3e   : > { %v1387_v0 = vld [vmem:[%s2191_s3 + $0x8] sm:$0xff]  ;;  %v611_v1 = vld [vmem:[%s609_s21] sm:$0xff]  ;;  %s1751_s19 = smov 88   ;;  %s1752_s21 = smov 80  }
  0x3f   : > { %v612_v2 = vmul.f32 5.656854, %v611_v1  ;;  %646 = vmatpush.bf16.msra.mxu0 %v1387_v0  ;;  %v1386_v4 = vld [vmem:[%s2191_s3] sm:$0xff]  ;;  %s1757_s30 = smov 40   ;;  %s1758_s29 = smov 56  }
  0x40   : > { %v1504_v7 = vld [vmem:[%s2192_s4] ss:$0 sm:$0xff]  ;;  %s1759_s15 = smov 48   ;;  %s1322_s9 = sshll.u32 %s1944_s27, 4 }
  0x41   : > { %v1967_v5 = vadd.f32 %v613_v3, %v612_v2  ;;  %s2195_s5 = sld [smem:[#allocation23_spill]] }
  0x43   : > { %v615_v6 = vpack.c.bf16 %v1967_v5, %v1967_v5  ;;  %647 = vmatpush.bf16.msra.mxu0 %v1386_v4 }
  0x46   : > { %1332 = vmatmul.msk.bf16.vlgmr.msra.gmra.mxu0 %vm636_vm0, %v615_v6 }
  0xc3   : > { %v649_v8 = vpop.f32.mrf.mxu0 }
  0xc4   : > { %v650_v9 = vadd.f32 %v1504_v7, %v649_v8 }
  0xc6   : > { %v653_v10 = vpack.c.bf16 %v650_v9, %v650_v9  ;;  %v654_v11 = vmul.f32 0.35355338, %v650_v9 }
  0xc8   : > { %v657_v12 = vpack.c.bf16 %v654_v11, %v654_v11  ;;  %v659_v13 = vunpack.c.l.b16 %v653_v10 }
  0xca   : > { %v1975_v14 = vpack.c.b16 %v659_v13, %v659_v13  ;;  %v726_v15 = vunpack.c.l.b16 %v657_v12 }
  0xcb   : > { %v651_v16 = vpop.f32.mrf.mxu0 }
  0xcc   : > { %661 = vrot.lane.b32.xlu0 %v1975_v14, %s1748_s13  ;;  %v727_v17 = vpack.c.b16 %v726_v15, %v726_v15  ;;  %s2019_s13 = scalar_lea.vmem [#allocation10], %s1322_s9 }
  0xce   : > { %860 = vrot.lane.b32.xlu2 %v727_v17, %s1749_s16  ;;  %728 = vrot.lane.b32.xlu1 %v727_v17, %s1750_s20  ;;  %s1760_s16 = smov 8   ;;  %s1761_s20 = smov 16  }
  0xd4   : > { %730 = vrot.lane.b32.xlu0 %v1975_v14, %s1751_s19  ;;  %s1762_s19 = smov 24  }
  0xd6   : > { %796 = vrot.lane.b32.xlu2 %v1975_v14, %s1752_s21  ;;  %862 = vrot.lane.b32.xlu1 %v1975_v14, %s1753_s14 }
  0xdc   : > { %794 = vrot.lane.b32.xlu0 %v727_v17, %s1754_s28  ;;  %s1396_s28 = sshll.u32 %s1734_s24, 4 }
 0x128   : > { %v861_v18 = vpop.permute.xlu2 %860 }
 0x130   : > { %v797_v19 = vpop.permute.xlu2 %796 }
 0x131   : > { %v802_v20 = vsel %vm663_vm1, %v797_v19, 0 }
 0x132   : > { %811 = vmatpush.bf16.xpose.msrb.mxu0 %v802_v20 }
 0x13e   : > { %v662_v21 = vpop.permute.xlu0 %661 }
 0x13f   : > { %v668_v22 = vsel %vm663_vm1, %v662_v21, 0 }
 0x140   : > { %v729_v23 = vpop.permute.xlu1 %728  ;;  %677 = vmatpush.bf16.xpose.msra.mxu1 %v668_v22 }
 0x146   : > { %v731_v24 = vpop.permute.xlu0 %730 }
 0x147   : > { %1333 = vmatmul.msk.bf16.vlgmr.msra.gmra.mxu1 %vm663_vm1, %v657_v12  ;;  %v736_v25 = vsel %vm663_vm1, %v731_v24, 0 }
 0x148   : > { %v863_v26 = vpop.permute.xlu1 %862  ;;  %745 = vmatpush.bf16.xpose.msra.mxu3 %v736_v25 }
 0x149   : > { %v868_v27 = vsel %vm663_vm1, %v863_v26, 0 }
 0x14e   : > { %v795_v28 = vpop.permute.xlu0 %794 }
 0x14f   : > { %1335 = vmatmul.msk.bf16.vlgmr.msra.gmra.mxu3 %vm663_vm1, %v729_v23  ;;  %1338 = vmatmul.msk.bf16.vlgmr.msrb.gmra.mxu0 %vm663_vm1, %v795_v28 }
 0x150   : > { %877 = vmatpush.bf16.xpose.msrb.mxu3 %v868_v27 }
 0x15f   : > { %1341 = vmatmul.msk.bf16.vlgmr.msrb.gmra.mxu3 %vm663_vm1, %v861_v18 }
 0x1c4   : > { %v679_v34 = vpop.f32.mrf.mxu1 }
 0x1c5   : > { %v686_v35 = vsel %vm1991_vm3, -1e+10, %v679_v34 }
 0x1c6   : > { %v687_v36 = vsel %vm663_vm1, %v686_v35, -inf }
 0x1c7   : > { %688 = vmax.xlane.f32.xlu1 %v687_v36 }
 0x1cc   : > { %v681_v37 = vpop.f32.mrf.mxu1  ;;  %v813_v38 = vpop.f32.mrf.mxu0 }
 0x1cd   : > { %v817_v43 = vsel %vm1991_vm3, -1e+10, %v813_v38 }
 0x1ce   : > { %v818_v45 = vsel %vm663_vm1, %v817_v43, -inf }
 0x1d2   : > { %v747_v39 = vpop.f32.mrf.mxu3 }
 0x1d3   : > { %v751_v40 = vsel %vm1991_vm3, -1e+10, %v747_v39 }
 0x1d4   : > { %v815_v41 = vpop.f32.mrf.mxu0  ;;  %v752_v42 = vsel %vm663_vm1, %v751_v40, -inf }
 0x1d5   : > { %753 = vmax.xlane.f32.xlu2 %v752_v42 }
 0x1da   : > { %v749_v44 = vpop.f32.mrf.mxu3 }
 0x1db   : > { %v1388_v44 = vld [vmem:[%s2195_s5] sm:$0xff] }
 0x1dd   : > { %819 = vmax.xlane.f32.xlu2 %v818_v45 }
 0x1e2   : > { %v879_v46 = vpop.f32.mrf.mxu3 }
 0x1e3   : > { %v883_v47 = vsel %vm1991_vm3, -1e+10, %v879_v46 }
 0x1e4   : > { %v884_v48 = vsel %vm663_vm1, %v883_v47, -inf }
 0x1e5   : > { %885 = vmax.xlane.f32.xlu0 %v884_v48 }
 0x1ea   : > { %v881_v49 = vpop.f32.mrf.mxu3 }
 0x1eb   : > { %v1505_v49 = vld [vmem:[%s2151_s6] ss:$0 sm:$0xff] }
 0x1f5   : > { %701 = vrot.lane.b32.xlu2 %v1975_v14, %s2167_s17 }
 0x1fd   : > { %898 = vrot.lane.b32.xlu2 %v1975_v14, %s1757_s30 }
 0x23a   : > { %v689_v50 = vpop.xlane.xlu1 %688 }
 0x23b   : > { %v690_v51 = vsub.f32 %v686_v35, %v689_v50 }
 0x23d   : > { %v691_v52 = vmul.f32 1.442695, %v690_v51 }
 0x23f   : > { %1512 = vpow2.f32 %v691_v52 }
 0x245   : > { %v1513_v53 = vpop.eup %1512 }
 0x246   : > { %v693_v54 = vsel %vm663_vm1, %v1513_v53, 0.0 }
 0x247   : > { %694 = vadd.xlane.f32.xlu1 %v693_v54 }
 0x248   : > { %v754_v55 = vpop.xlane.xlu2 %753 }
 0x249   : > { %v755_v58 = vsub.f32 %v751_v40, %v754_v55  ;;  %v1763_v55 = vmov 32.0  }
 0x24b   : > { %v756_v60 = vmul.f32 1.442695, %v755_v58 }
 0x250   : > { %v820_v56 = vpop.xlane.xlu2 %819 }
 0x251   : > { %v821_v57 = vsub.f32 %v817_v43, %v820_v56  ;;  %v1389_v43 = vld [vmem:[%s2195_s5 + $0x8] sm:$0xff] }
 0x252   : > { %956 = vmatpush.bf16.msra.mxu0 %v1389_v43 }
 0x253   : > { %v822_v59 = vmul.f32 1.442695, %v821_v57 }
 0x255   : > { %1514 = vpow2.f32 %v822_v59 }
 0x256   : > { %1516 = vpow2.f32 %v756_v60  ;;  %957 = vmatpush.bf16.msra.mxu0 %v1388_v44 }
 0x258   : > { %v702_v61 = vpop.permute.xlu2 %701  ;;  %v886_v62 = vpop.xlane.xlu0 %885 }
 0x259   : > { %v708_v63 = vsel %vm706_vm4, %v702_v61, 0  ;;  %v887_v1 = vsub.f32 %v883_v47, %v886_v62 }
 0x25a   : > { %717 = vmatpush.bf16.msra.mxu2 %v708_v63 }
 0x25b   : > { %v1515_v0 = vpop.eup %1514  ;;  %v888_v3 = vmul.f32 1.442695, %v887_v1 }
 0x25c   : > { %v824_v2 = vsel %vm663_vm1, %v1515_v0, 0.0  ;;  %v1517_v4 = vpop.eup %1516 }
 0x25d   : > { %825 = vadd.xlane.f32.xlu0 %v824_v2  ;;  %1518 = vpow2.f32 %v888_v3  ;;  %v758_v6 = vsel %vm663_vm1, %v1517_v4, 0.0  ;;  %v1391_v2 = vld [vmem:[#allocation8 + $0x8] sm:$0xff]  ;;  %v1390_v3 = vld [vmem:[#allocation8] sm:$0xff] }
 0x260   : > { %766 = vrot.lane.b32.xlu1 %v1975_v14, %s1758_s29  ;;  %v899_v15 = vpop.permute.xlu2 %898 }
 0x261   : > { %v904_v17 = vsel %vm706_vm4, %v899_v15, 0 }
 0x263   : > { %v1519_v7 = vpop.eup %1518 }
 0x264   : > { %v890_v8 = vsel %vm663_vm1, %v1519_v7, 0.0 }
 0x265   : > { %759 = vadd.xlane.f32.xlu0 %v758_v6 }
 0x26d   : > { %891 = vadd.xlane.f32.xlu0 %v890_v8  ;;  %v1394_v8 = vld [vmem:[%s2156_s11 + $0x10] sm:$0xff] }
 0x281   : > { %832 = vrot.lane.b32.xlu0 %v1975_v14, %s1759_s15  ;;  %s2196_s15 = sld [smem:[#allocation28_spill]] }
 0x287   : > { %s1164_s9 = scalar_lea.hbm %s2196_s15, %s1396_s28  ;;  %s1644_s3 = scalar_lea.hbm %s2196_s15, 32 }
 0x2ba   : > { %v695_v9 = vpop.xlane.xlu1 %694 }
 0x2bb   : > { %1520 = vrcp.f32 %v695_v9 }
 0x2c1   : > { %v1521_v10 = vpop.eup %1520 }
 0x2c2   : > { %v697_v11 = vmul.f32 %v1521_v10, %v1513_v53  ;;  %v1393_v10 = vld [vmem:[%s2156_s11 + $0x8] sm:$0xff] }
 0x2c4   : > { %v698_v12 = vpack.c.bf16 %v697_v11, %v697_v11 }
 0x2c6   : > { %1334 = vmatmul.msk.bf16.vlgmr.msra.gmra.mxu2 %vm663_vm1, %v698_v12  ;;  %700 = vst.msk [vmem:[%s2019_s13] sm:$0xf] %vm699_vm5, %v698_v12 }
 0x2d0   : > { %v826_v13 = vpop.xlane.xlu0 %825 }
 0x2d1   : > { %1522 = vrcp.f32 %v826_v13 }
 0x2d2   : > { %v767_v16 = vpop.permute.xlu1 %766 }
 0x2d3   : > { %v772_v14 = vsel %vm706_vm4, %v767_v16, 0 }
 0x2d4   : > { %781 = vmatpush.bf16.msrb.mxu2 %v772_v14 }
 0x2d7   : > { %v1523_v18 = vpop.eup %1522 }
 0x2d8   : > { %913 = vmatpush.bf16.msra.mxu2 %v904_v17  ;;  %v828_v19 = vmul.f32 %v1523_v18, %v1515_v0  ;;  %v760_v20 = vpop.xlane.xlu0 %759  ;;  %v1506_v17 = vld [vmem:[%s2152_s7] ss:$0 sm:$0xff] }
 0x2d9   : > { %1524 = vrcp.f32 %v760_v20 }
 0x2da   : > { %v829_v21 = vpack.c.bf16 %v828_v19, %v828_v19  ;;  %v1507_v19 = vld [vmem:[%s2153_s8] ss:$0 sm:$0xff] }
 0x2dc   : > { %1339 = vst.msk [vmem:[%s2019_s13 + $0x8] sm:$0xf] %vm699_vm5, %v829_v21 }
 0x2df   : > { %v1525_v22 = vpop.eup %1524 }
 0x2e0   : > { %v762_v23 = vmul.f32 %v1525_v22, %v1517_v4  ;;  %v892_v24 = vpop.xlane.xlu0 %891  ;;  %v1395_v4 = vld [vmem:[%s2156_s11 + $0x18] sm:$0xff] }
 0x2e1   : > { %1526 = vrcp.f32 %v892_v24  ;;  %1086 = vmatpush.bf16.msra.mxu3 %v1395_v4  ;;  %v1392_v24 = vld [vmem:[%s2156_s11] sm:$0xff] }
 0x2e2   : > { %v763_v25 = vpack.c.bf16 %v762_v23, %v762_v23  ;;  %1528 = vrcp.f32 %v1763_v55 }
 0x2e4   : > { %1337 = vmatmul.msk.bf16.vlgmr.msrb.gmra.mxu2 %vm663_vm1, %v763_v25  ;;  %1336 = vst.msk [vmem:[%s2019_s13 + $0x4] sm:$0xf] %vm699_vm5, %v763_v25  ;;  %v1508_v25 = vld [vmem:[%s2155_s10] ss:$0 sm:$0xff] }
 0x2e5   : > { %1087 = vmatpush.bf16.msra.mxu3 %v1394_v8 }
 0x2e7   : > { %v1527_v26 = vpop.eup %1526 }
 0x2e8   : > { %v894_v27 = vmul.f32 %v1527_v26, %v1519_v7  ;;  %v1529_v56 = vpop.eup %1528 }
 0x2e9   : > { %v970_v57 = vmul.f32 32.0, %v1529_v56  ;;  %vm974_vm9 = vweird.f32 %v1529_v56  ;;  %1088 = vmatpush.bf16.msra.mxu3 %v1393_v10 }
 0x2ea   : > { %v895_v28 = vpack.c.bf16 %v894_v27, %v894_v27 }
 0x2eb   : > { %v971_v58 = vsub.f32 1.0, %v970_v57 }
 0x2ec   : > { %1342 = vst.msk [vmem:[%s2019_s13 + $0xc] sm:$0xf] %vm699_vm5, %v895_v28 }
 0x2ed   : > { %v972_v59 = vmul.f32 %v1529_v56, %v971_v58  ;;  %1089 = vmatpush.bf16.msra.mxu3 %v1392_v24 }
 0x2ef   : > { %v973_v60 = vadd.f32 %v1529_v56, %v972_v59 }
 0x2f1   : > { %v2048_v61 = vsel %vm974_vm9, %v1529_v56, %v973_v60 }
 0x2f3   : > { %v833_v29 = vpop.permute.xlu0 %832 }
 0x2f4   : > { %1343 = vmatmul.msk.bf16.vlgmr.msra.gmra.mxu2 %vm663_vm1, %v895_v28  ;;  %v838_v30 = vsel %vm706_vm4, %v833_v29, 0 }
 0x2f5   : > { %847 = vmatpush.bf16.msrb.mxu1 %v838_v30 }
 0x2f8   : > { %1340 = vmatmul.msk.bf16.vlgmr.msrb.gmra.mxu1 %vm663_vm1, %v829_v21 }
 0x2f9   : > { %1033 = vmatpush.bf16.msra.mxu1 %v1391_v2 }
 0x2fd   : > { %1034 = vmatpush.bf16.msra.mxu1 %v1390_v3 }
 0x349   : > { %v719_v31 = vpop.f32.mrf.mxu2 }
 0x34a   : > { %v723_v32 = vpack.c.bf16 %v719_v31, %v719_v31  ;;  %v1509_v31 = vld [vmem:[%s2157_s12] ss:$0 sm:$0xff] }
 0x34c   : > { %724 = vst.msk [vmem:[#allocation2] sm:$0xf] %vm699_vm5, %v723_v32 }
 0x351   : > { %v721_v33 = vpop.f32.mrf.mxu2 }
 0x367   : > { %v783_v34 = vpop.f32.mrf.mxu2 }
 0x368   : > { %v787_v35 = vpack.c.bf16 %v783_v34, %v783_v34 }
 0x36a   : > { %789 = vrot.lane.b32.xlu1 %v787_v35, %s1760_s16  ;;  %s1165_s16 = sshll.u32 %s2019_s13, 4  ;;  %s1166_s16 = int_to_ptr.vmem [resolvable:$true] %s1165_s16 }
 0x36f   : > { %v785_v36 = vpop.f32.mrf.mxu2 }
 0x375   : > { %v849_v37 = vpop.f32.mrf.mxu1 }
 0x376   : > { %v853_v38 = vpack.c.bf16 %v849_v37, %v849_v37 }
 0x377   : > { %v915_v39 = vpop.f32.mrf.mxu2 }
 0x378   : > { %v919_v40 = vpack.c.bf16 %v915_v39, %v915_v39  ;;  %855 = vrot.lane.b32.xlu2 %v853_v38, %s1761_s20  ;;  %s1167_s20 = sshll.u32 %s1164_s9, 4  ;;  %s1168_s20 = int_to_ptr.hbm [resolvable:$true] %s1167_s20 }
 0x379   : > { %s1638_s21 = sshra.s32 %s1168_s20, 4  ;;  %s1639_s21 = int_to_ptr.hbm [resolvable:$true] %s1638_s21 }
 0x37a   : > { %921 = vrot.lane.b32.xlu1 %v919_v40, %s1762_s19  ;;  %s1137_s19 = scalar_lea.sflag [#allocation11], %s1944_s27  ;;  %s1640_s14 = scalar_lea.hbm %s1639_s21, 16 }
 0x37b   : > { %p1641_p1 = scmp.ne.s32.totalorder %s1639_s21, %s1640_s14  ;;  %p1645_p12 = scmp.lt.s32.totalorder %s1639_s21, %s2196_s15 }
 0x37c   : > { %p1646_p13 = scmp.lt.s32.totalorder %s1644_s3, %s1640_s14 }
 0x37d   : > { %v851_v41 = vpop.f32.mrf.mxu1  ;;  %p1642_p3 = pnand %p1641_p1, %p1926_p2 }
 0x37e   : > { %p1647_p0 = por %p1646_p13, %p1645_p12 }
 0x37f   : > { %v917_v42 = vpop.f32.mrf.mxu2  ;;  %p1643_p11 = pneg %p1642_p3 }
 0x381   : > { %p1648_p4 = pnand %p1647_p0, %p1643_p11 }
 0x3d2   : > { %v856_v46 = vpop.permute.xlu2 %855 }
 0x3dc   : > { %v790_v45 = vpop.permute.xlu1 %789 }
 0x3dd   : > { %793 = vst.msk [vmem:[#allocation2] sm:$0xf] %vm792_vm6, %v790_v45 }
 0x3de   : > { %859 = vst.msk [vmem:[#allocation2] sm:$0xf] %vm858_vm7, %v856_v46 }
 0x3ec   : > { %v922_v47 = vpop.permute.xlu1 %921 }
 0x3ed   : > { %925 = vst.msk [vmem:[#allocation2] sm:$0xf] %vm924_vm8, %v922_v47 }
 0x3f4   : > { %v926_v48 = vld [vmem:[#allocation2] sm:$0xf] }
 0x3f5   : > { %1352 = vmatmul.msk.bf16.vlgmr.msra.gmra.mxu0 %vm636_vm0, %v926_v48 }
 0x472   : > { %v959_v50 = vpop.f32.mrf.mxu0 }
 0x473   : > { %v960_v51 = vadd.f32 %v1505_v49, %v959_v50 }
 0x475   : > { %v963_v52 = vadd.f32 %v960_v51, %v1967_v5 }
 0x477   : > { %v966_v53 = vsel %vm636_vm0, %v963_v52, 0.0 }
 0x478   : > { %967 = vadd.xlane.f32.xlu2 %v966_v53 }
 0x47a   : > { %v961_v54 = vpop.f32.mrf.mxu0 }
 0x4eb   : > { %v968_v62 = vpop.xlane.xlu2 %967 }
 0x4ec   : > { %v976_v63 = vmul.f32 %v2048_v61, %v968_v62 }
 0x4ee   : > { %v977_v0 = vsub.f32 %v963_v52, %v976_v63 }
 0x4f0   : > { %v978_v1 = vmul.f32 %v977_v0, %v977_v0 }
 0x4f2   : > { %v979_v5 = vsel %vm636_vm0, %v978_v1, 0.0 }
 0x4f3   : > { %980 = vadd.xlane.f32.xlu1 %v979_v5 }
 0x566   : > { %v981_v6 = vpop.xlane.xlu1 %980 }
 0x567   : > { %v982_v7 = vmul.f32 %v981_v6, %v2048_v61 }
 0x569   : > { %v983_v9 = vadd.f32 1e-05, %v982_v7 }
 0x56b   : > { %1530 = vrsqrt.f32 %v983_v9  ;;  %vm990_vm11 = vweird.f32 %v983_v9 }
 0x571   : > { %v1531_v11 = vpop.eup %1530 }
 0x572   : > { %v985_v12 = vmul.f32 %v1531_v11, %v983_v9  ;;  %vm991_vm10 = vweird.f32 %v1531_v11 }
 0x573   : > { %vm992_vm12 = vmor %vm990_vm11, %vm991_vm10 }
 0x574   : > { %v986_v13 = vmul.f32 %v1531_v11, %v985_v12 }
 0x576   : > { %v987_v15 = vmul.f32 0.5, %v986_v13 }
 0x578   : > { %v988_v16 = vsub.f32 1.5, %v987_v15 }
 0x57a   : > { %v989_v14 = vmul.f32 %v1531_v11, %v988_v16 }
 0x57c   : > { %v993_v18 = vsel %vm992_vm12, %v1531_v11, %v989_v14 }
 0x57d   : > { %v994_v20 = vmul.f32 %v993_v18, %v977_v0 }
 0x57f   : > { %v998_v21 = vmul.f32 %v1506_v17, %v994_v20 }
 0x581   : > { %v1002_v22 = vadd.f32 %v1507_v19, %v998_v21 }
 0x583   : > { %v1003_v23 = vpack.c.bf16 %v1002_v22, %v1002_v22 }
 0x585   : > { %1361 = vmatmul.msk.bf16.vlgmr.msra.gmra.mxu1 %vm636_vm0, %v1003_v23 }
 0x602   : > { %v1036_v26 = vpop.f32.mrf.mxu1 }
 0x603   : > { %v1037_v27 = vadd.f32 %v1508_v25, %v1036_v26 }
 0x605   : > { %v1040_v28 = vmax.f32 %v1037_v27, 0.0 }
 0x607   : > { %v1041_v29 = vpack.c.bf16 %v1040_v28, %v1040_v28 }
 0x609   : > { %1378 = vmatmul.msk.bf16.vlgmr.msra.gmra.mxu3 %vm1078_vm13, %v1041_v29 }
 0x60a   : > { %v1038_v30 = vpop.f32.mrf.mxu1 }
 0x68c   : > { %v1091_v32 = vpop.f32.mrf.mxu3 }
 0x68d   : > { %v1092_v33 = vadd.f32 %v1509_v31, %v1091_v32 }
 0x68f   : > { %v1095_v34 = vadd.f32 %v1092_v33, %v1002_v22 }
 0x691   : > { %v1098_v35 = vsel %vm636_vm0, %v1095_v34, 0.0 }
 0x692   : > { %1099 = vadd.xlane.f32.xlu0 %v1098_v35 }
 0x694   : > { %v1093_v36 = vpop.f32.mrf.mxu3 }
 0x705   : > { %v1100_v37 = vpop.xlane.xlu0 %1099 }
 0x706   : > { %v1101_v38 = vmul.f32 %v1100_v37, %v2048_v61 }
 0x708   : > { %v1102_v39 = vsub.f32 %v1095_v34, %v1101_v38 }
 0x70a   : > { %v1103_v40 = vmul.f32 %v1102_v39, %v1102_v39 }
 0x70c   : > { %v1104_v41 = vsel %vm636_vm0, %v1103_v40, 0.0 }
 0x70d   : > { %1105 = vadd.xlane.f32.xlu2 %v1104_v41 }
 0x70e   : > { %1651 = shalt.err (!%p1648_p4)
}
 0x70f   : > { %s1764_s13 = smov 4   ;;  %s2197_s28 = smov 64   ;;  %vm1129_vm1 = vcmask 257024  }
 0x710   : > { %1408 = dma.vmem_to_hbm [thread:$0]  (%p1926_p2), %s1166_s16, 256, %s1168_s20, %s1137_s19, %s2197_s28, %s2197_s28, %s1764_s13  }
 0x711   : > { %s1321_s1 = sshll.u32 %s1944_s27, 2  ;;  %s1381_s3 = sshll.u32 %s1734_s24, 2 }
 0x712   : > { %s2198_s17 = sld [smem:[#allocation25_spill]]  ;;  %s598_s14 = scalar_lea.vmem [#allocation9], %s1321_s1 }
 0x713   : > { %s2199_s9 = sld [smem:[#allocation26_spill]]  ;;  %s1150_s24 = sshll.u32 %s598_s14, 4  ;;  %s1151_s24 = int_to_ptr.vmem [resolvable:$true] %s1150_s24 }
 0x714   : > { %s2200_s19 = sld [smem:[#allocation27_spill]]  ;;  %s1132_s28 = scalar_lea.sflag [#allocation5], %s1944_s27 }
 0x718   : > { %v1510_v51 = vld [vmem:[%s2198_s17] ss:$0 sm:$0xff] }
 0x719   : > { %v1511_v53 = vld [vmem:[%s2199_s9] ss:$0 sm:$0xff] }
 0x71a   : > { %s1148_s21 = scalar_lea.hbm %s2200_s19, %s1381_s3  ;;  %s1672_s1 = scalar_lea.hbm %s2200_s19, 8 }
 0x71b   : > { %s1152_s13 = sshll.u32 %s1148_s21, 4  ;;  %s1153_s13 = int_to_ptr.hbm [resolvable:$true] %s1152_s13 }
 0x71c   : > { %s1666_s4 = sshra.s32 %s1153_s13, 4  ;;  %s1667_s4 = int_to_ptr.hbm [resolvable:$true] %s1666_s4 }
 0x71d   : > { %s1668_s5 = scalar_lea.hbm %s1667_s4, 4  ;;  %p1673_p7 = scmp.lt.s32.totalorder %s1667_s4, %s2200_s19 }
 0x71e   : > { %p1669_p6 = scmp.ne.s32.totalorder %s1667_s4, %s1668_s5  ;;  %p1674_p1 = scmp.lt.s32.totalorder %s1672_s1, %s1668_s5 }
 0x720   : > { %p1670_p9 = pnand %p1669_p6, %p1926_p2  ;;  %p1675_p3 = por %p1674_p1, %p1673_p7 }
 0x722   : > { %p1671_p10 = pneg %p1670_p9 }
 0x724   : > { %p1676_p11 = pnand %p1675_p3, %p1671_p10 }
 0x780   : > { %v1106_v42 = vpop.xlane.xlu2 %1105 }
 0x781   : > { %v1107_v43 = vmul.f32 %v1106_v42, %v2048_v61 }
 0x783   : > { %v1108_v44 = vadd.f32 1e-05, %v1107_v43 }
 0x785   : > { %1532 = vrsqrt.f32 %v1108_v44  ;;  %vm1115_vm15 = vweird.f32 %v1108_v44 }
 0x78b   : > { %v1533_v45 = vpop.eup %1532 }
 0x78c   : > { %v1110_v46 = vmul.f32 %v1533_v45, %v1108_v44  ;;  %vm1116_vm14 = vweird.f32 %v1533_v45 }
 0x78d   : > { %vm1117_vm0 = vmor %vm1115_vm15, %vm1116_vm14 }
 0x78e   : > { %v1111_v47 = vmul.f32 %v1533_v45, %v1110_v46 }
 0x790   : > { %v1112_v48 = vmul.f32 0.5, %v1111_v47 }
 0x792   : > { %v1113_v49 = vsub.f32 1.5, %v1112_v48 }
 0x794   : > { %v1114_v50 = vmul.f32 %v1533_v45, %v1113_v49 }
 0x796   : > { %v1118_v52 = vsel %vm1117_vm0, %v1533_v45, %v1114_v50 }
 0x797   : > { %v1119_v54 = vmul.f32 %v1118_v52, %v1102_v39 }
 0x799   : > { %v1123_v55 = vmul.f32 %v1510_v51, %v1119_v54 }
 0x79b   : > { %v1127_v56 = vadd.f32 %v1511_v53, %v1123_v55 }
 0x79d   : > { %v1128_v57 = vpack.c.bf16 %v1127_v56, %v1127_v56 }
 0x79f   : > { %1130 = vst.msk [vmem:[%s598_s14] sm:$0xf] %vm1129_vm1, %v1128_v57 }
 0x7a0   : > { %1679 = shalt.err (!%p1676_p11)
}
 0x7a1   : > { %1407 = dma.vmem_to_hbm [thread:$0]  (%p1926_p2), %s1151_s24, 64, %s1153_s13, %s1132_s28  }
 0x7a2 PF: > { %s2201_s27 = sld [smem:[#allocation16_spill]]  ;;  %p1423_p12 = pnand %p1317_p8, %p1897_p5 }
 0x7a4   : > { %p1424_p13 = pneg %p1423_p12 }
 0x7a8   : > { %s1182_s16 = sand.u32 1, %s2201_s27  }
 0x7a9   : > { %s1183_s20 = scalar_lea.sflag [#allocation5], %s1182_s16 }
 0x7aa   : > { %1713 = dma.done.wait (%p1424_p13), %s1183_s20, 64  }
 0x7ab   : > { %1715 = vsyncadd (%p1424_p13), %s1183_s20, 4294967232  ;;  %s1193_s21 = scalar_lea.sflag [#allocation11], %s1182_s16 }
 0x7ac   : > { %1717 = dma.done.wait (%p1424_p13), %s1193_s21, 256  }
 0x7ad   : > { %1719 = vsyncadd (%p1424_p13), %s1193_s21, 4294967040  ;;  %s37_s26 = sadd.s32 1, %s1742_s26   ;;  %s2203_s21 = smov %s1726_s22 }
 0x7ae   : > { %p34_p0 = scmp.ge.s32.totalorder %s37_s26, 4   ;;  %s2204_s22 = smov %s1730_s23 }
 0x7af   : > { %s2205_s23 = smov %s1939_s18  ;;  %s2206_s24 = smov %s1738_s25 }
 0x7b0   : > { %s2207_s25 = smov %s2209_s0  ;;  %36 = sbr.rel (!%p34_p0) target bundleno = 21 (0x15), region = 156 }
 0x7b5   :  { %1199 = vsyncpa [#allocation4], 1 }
 0x7b6   :  { %1201 = vsyncpa [#allocation4 + $0x1], 1 }
 0x7b7   :  { %1202 = vsyncpa [#allocation7], 1 }
 0x7b8   :  { %1203 = vsyncpa [#allocation5], 1 }
 0x7b9   :  { %1205 = vsyncpa [#allocation5 + $0x1], 1 }
 0x7ba   :  { %1206 = vsyncpa [#allocation11], 1 }
 0x7bb   :  { %1208 = vsyncpa [#allocation11 + $0x1], 1 }

// kernel: tpu_custom_call.1
= control target key start
LH: loop header
LB: loop body
LE: loop exit
PB: predicated region body
PF: predicated region fallthrough
CT: control target
= control target key end

     0   :  { %s2145_s0 = inlined_call_operand.vmem [shape: f32[2,8,32], index: 0, kind: input, shape index: {}]   ;;  %s2146_s1 = inlined_call_operand.hbm [shape: f32[2,1,8], index: 1, kind: input, shape index: {}]   ;;  %s2147_s2 = inlined_call_operand.hbm [shape: f32[8,32], index: 2, kind: input, shape index: {}]   ;;  %s2148_s3 = inlined_call_operand.vmem [shape: bf16[32,96], index: 3, kind: input, shape index: {}]   ;;  %s2149_s4 = inlined_call_operand.vmem [shape: f32[1,96], index: 4, kind: input, shape index: {}]   ;;  %s2150_s5 = inlined_call_operand.vmem [shape: bf16[32,32], index: 5, kind: input, shape index: {}]   ;;  %s2151_s6 = inlined_call_operand.vmem [shape: f32[1,32], index: 6, kind: input, shape index: {}]   ;;  %s2152_s7 = inlined_call_operand.vmem [shape: f32[1,32], index: 7, kind: input, shape index: {}]   ;;  %s2153_s8 = inlined_call_operand.vmem [shape: f32[1,32], index: 8, kind: input, shape index: {}]   ;;  %s2154_s9 = inlined_call_operand.hbm [shape: bf16[32,64], index: 9, kind: input, shape index: {}]   ;;  %s2155_s10 = inlined_call_operand.vmem [shape: f32[1,64], index: 10, kind: input, shape index: {}]   ;;  %s2156_s11 = inlined_call_operand.vmem [shape: bf16[64,32], index: 11, kind: input, shape index: {}]   ;;  %s2157_s12 = inlined_call_operand.vmem [shape: f32[1,32], index: 12, kind: input, shape index: {}]   ;;  %s2158_s13 = inlined_call_operand.vmem [shape: f32[1,32], index: 13, kind: input, shape index: {}]   ;;  %s2159_s14 = inlined_call_operand.vmem [shape: f32[1,32], index: 14, kind: input, shape index: {}]   ;;  %s2160_s15 = inlined_call_operand.hbm [shape: bf16[2,8,32], index: 15, kind: output, shape index: {0}]   ;;  %s2161_s16 = inlined_call_operand.hbm [shape: bf16[2,4,8,8], index: 16, kind: output, shape index: {1}]  }
   0x1   :  { %2168 = sst [smem:[#allocation18_spill]] %s2145_s0 }
   0x2   :  { %2169 = sst [smem:[#allocation19_spill]] %s2146_s1 }
   0x3   :  { %2170 = sst [smem:[#allocation20_spill]] %s2147_s2 }
   0x4   :  { %2171 = sst [smem:[#allocation21_spill]] %s2148_s3 }
   0x5   :  { %2172 = sst [smem:[#allocation22_spill]] %s2149_s4 }
   0x6   :  { %2173 = sst [smem:[#allocation23_spill]] %s2150_s5 }
   0x7   :  { %2174 = sst [smem:[#allocation24_spill]] %s2154_s9 }
   0x8   :  { %2175 = sst [smem:[#allocation25_spill]] %s2158_s13 }
   0x9   :  { %2176 = sst [smem:[#allocation26_spill]] %s2159_s14 }
   0xa   :  { %2177 = sst [smem:[#allocation27_spill]] %s2160_s15 }
   0xb   :  { %2178 = sst [smem:[#allocation28_spill]] %s2161_s16 }
   0xc   :  { %22 = vsyncpa [#allocation4], 0 }
   0xd   :  { %24 = vsyncpa [#allocation4 + $0x1], 0 }
   0xe   :  { %25 = vsyncpa [#allocation7], 0 }
   0xf   :  { %26 = vsyncpa [#allocation5], 0 }
  0x10   :  { %28 = vsyncpa [#allocation5 + $0x1], 0 }
  0x11   :  { %29 = vsyncpa [#allocation11], 0 }
  0x12   :  { %31 = vsyncpa [#allocation11 + $0x1], 0  ;;  %s1850_s21 = smov 0   ;;  %s1852_s22 = smov 0  }
  0x13   :  { %s1854_s23 = smov 0   ;;  %s1856_s24 = smov 0  }
  0x14   :  { %s1858_s25 = smov 0   ;;  %s1860_s26 = smov 0  }
  0x15 LB: > { %2179 = sst [smem:[#allocation16_spill]] %s1722_s21  ;;  %s2162_s27 = sadd.s32 4294967295, %s1742_s26   ;;  %s1742_s26 = sphi %s1860_s26, %s37_s26   ;;  %s1738_s25 = sphi %s1858_s25, %s2207_s25   ;;  %s1734_s24 = sphi %s1856_s24, %s2206_s24   ;;  %s1730_s23 = sphi %s1854_s23, %s2205_s23   ;;  %s1726_s22 = sphi %s1852_s22, %s2204_s22   ;;  %s1722_s21 = sphi %s1850_s21, %s2203_s21  }
  0x16   : > { %s1313_s28 = sadd.s32 4294967294, %s1742_s26   ;;  %p95_p0 = scmp.ne.s32.totalorder %s1726_s22, %s1722_s21 }
  0x17   : > { %p1886_p1 = scmp.eq.s32.totalorder %s2162_s27, 0  ;;  %p400_p2 = scmp.eq.s32.totalorder %s1313_s28, 1 }
  0x18   : > { %p1314_p4 = scmp.ge.s32.totalorder %s1742_s26, 1  ;;  %p435_p6 = scmp.lt.s32.totalorder %s1742_s26, 3 }
  0x19   : > { %p1892_p3 = por %p1886_p1, %p95_p0  ;;  %p1897_p5 = por %p400_p2, %p95_p0 }
  0x1a   : > { %s2184_s2 = sld [smem:[#allocation20_spill]]  ;;  %p1905_p7 = pnand %p1314_p4, %p435_p6 }
  0x1b   : > { %s2182_s0 = scalar_select %p1897_p5, 1, 0 }
  0x1c   : > { %p1317_p8 = scmp.ge.s32.totalorder %s1742_s26, 2  ;;  %p1411_p9 = pneg %p1905_p7 }
  0x1d   : > { %2183 = sst [smem:[#allocation17_spill]] %s2182_s0  ;;  %s1744_s28 = smov [#allocation6]  }
  0x1e   : > { %s449_s27 = sshll.u32 %s1744_s28, 4  ;;  %s2186_s9 = sld [smem:[#allocation24_spill]]  ;;  %s450_s27 = int_to_ptr.vmem [resolvable:$true] %s449_s27 }
  0x1f   : > { %p1412_p10 = pnand %p1411_p9, %p1886_p1  ;;  %s1746_s15 = smov 64  }
  0x20   : > { %s447_s19 = sshll.u32 %s2184_s2, 4  ;;  %s1745_s2 = smov [#allocation8]   ;;  %s448_s19 = int_to_ptr.hbm [resolvable:$true] %s447_s19 }
  0x21   : > { %s478_s21 = sshll.u32 %s1745_s2, 4  ;;  %s1747_s28 = smov 4   ;;  %s479_s21 = int_to_ptr.vmem [resolvable:$true] %s478_s21 }
  0x22   : > { %1414 = dma.hbm_to_vmem [thread:$0]  (!%p1412_p10), %s448_s19, 128, %s450_s27, [#allocation7]  }
  0x23   : > { %s2187_s14 = sadd.s32 4294967295, %s1742_s26   ;;  %s49_s0 = sadd.s32 1, %s1738_s25 }
  0x24   : > { %s476_s18 = sshll.u32 %s2186_s9, 4  ;;  %p394_p11 = scmp.eq.s32.totalorder %s2187_s14, 1  ;;  %s477_s18 = int_to_ptr.hbm [resolvable:$true] %s476_s18 }
  0x25   : > { %1417 = dma.hbm_to_vmem [thread:$0]  (!%p1412_p10), %s477_s18, 256, %s479_s21, [#allocation7], %s1746_s15, %s1746_s15, %s1747_s28  }
  0x26   : > { %p51_p12 = scmp.ge.s32.totalorder %s49_s0, 2  ;;  %s82_s17 = sadd.s32 1, %s1730_s23 }
  0x27   : > { %p89_p13 = scmp.ne.s32.totalorder %s1730_s23, %s1726_s22  ;;  %p90_p0 = scmp.eq.s32.totalorder %s1742_s26, 0 }
  0x28   : > { %s2209_s0 = smov (%p51_p12, %s49_s0), 0  ;;  %p1431_p4 = scmp.lt.s32.totalorder %s1742_s26, 2 }
  0x29   : > { %p1926_p2 = por %p394_p11, %p89_p13  ;;  %s79_s27 = ssub.s32 %s1738_s25, %s2209_s0 }
  0x2a   : > { %s514_s19 = sand.u32 1, %s1730_s23   ;;  %p80_p6 = scmp.eq.s32.totalorder %s79_s27, 0 }
  0x2b   : > { %p91_p9 = por %p90_p0, %p89_p13  ;;  %s2189_s1 = sld [smem:[#allocation19_spill]] }
  0x2c   : > { %s1939_s18 = scalar_select %p80_p6, %s1730_s23, %s82_s17  }
  0x2d   : > { %s517_s9 = scalar_lea.vmem [#allocation3], %s514_s19  ;;  %p1419_p10 = pnand %p1431_p4, %p91_p9 }
  0x2e   : > { %s524_s13 = sshll.u32 %s517_s9, 4  ;;  %s515_s16 = scalar_lea.sflag [#allocation4], %s514_s19  ;;  %s525_s13 = int_to_ptr.vmem [resolvable:$true] %s524_s13 }
  0x2f   : > { %533 = sbr.rel (%p1905_p7) target bundleno = 1954 (0x7a2), region = 80  ;;  %s1944_s27 = sand.u32 (!%p1905_p7), 1, %s1726_s22  }
  0x30   : > { %s536_s15 = scalar_lea.sflag (!%p1905_p7), [#allocation4], %s1944_s27  ;;  %s538_s17 = scalar_lea.vmem (!%p1905_p7), [#allocation3], %s1944_s27 }
  0x31   : > { %s520_s14 = scalar_lea.hbm %s2189_s1, %s1738_s25 }
  0x32   : > { %s522_s28 = sshll.u32 %s520_s14, 4  ;;  %s523_s28 = int_to_ptr.hbm [resolvable:$true] %s522_s28 }
  0x33   : > { %1421 = dma.hbm_to_vmem [thread:$0]  (!%p1419_p10), %s523_s28, 16, %s525_s13, %s515_s16  }
  0x34   : > { %1705 = dma.done.wait (%p1892_p3), %s536_s15, 16  }
  0x35   : > { %1707 = vsyncadd (%p1892_p3), %s536_s15, 4294967280 }
  0x36   : > { %1709 = dma.done.wait (%p1886_p1), [#allocation7], 384  }
  0x37   : > { %1711 = vsyncadd (%p1886_p1), [#allocation7], 4294966912  ;;  %p606_p7 = scmp.lt.s32.totalorder %s1734_s24, 1  ;;  %s2190_s19 = sld [smem:[#allocation18_spill]]  ;;  %v613_v3 = vld [vmem:[#allocation6] sm:$0xff]  ;;  %vm636_vm0 = vcmask 261120  }
  0x38   : > { %s2191_s3 = sld [smem:[#allocation21_spill]]  ;;  %s1749_s16 = smov 104   ;;  %vm663_vm1 = vcmask 64512   ;;  %v655_v29 = vld [vmem:[%s538_s17] sm:$0x1]  ;;  %v1755_v30 = vmov 0  }
  0x39   : > { %s607_s9 = scalar_select %p606_p7, %s1734_s24, 1  ;;  %vm656_vm2 = vcmp.eq.f32.partialorder %v655_v29, 0.0  ;;  %vm706_vm4 = vcmask 1043456   ;;  %vm699_vm5 = vcmask 60416   ;;  %vm792_vm6 = vcmask 126016  }
  0x3a   : > { %s2192_s4 = sld [smem:[#allocation22_spill]]  ;;  %s1750_s20 = smov 120   ;;  %v683_v31 = vsel %vm656_vm2, 1, %v1755_v30  ;;  %vm858_vm7 = vcmask 191616   ;;  %vm924_vm8 = vcmask 257216   ;;  %vm1078_vm13 = vcmask 523264  }
  0x3b   : > { %s1323_s13 = sshll.u32 %s607_s9, 3  ;;  %s1753_s14 = smov 72   ;;  %v684_v32 = vperm.slane %v683_v31, 0 }
  0x3c   : > { %s1754_s28 = smov 112   ;;  %s2167_s17 = smov 64  }
  0x3d   : > { %s609_s21 = scalar_lea.vmem %s2190_s19, %s1323_s13  ;;  %s1748_s13 = smov 96   ;;  %vm1991_vm3 = vcmp.eq.s32.totalorder %v684_v32, 1 }
  0x3e   : > { %v1387_v0 = vld [vmem:[%s2191_s3 + $0x8] sm:$0xff]  ;;  %v611_v1 = vld [vmem:[%s609_s21] sm:$0xff]  ;;  %s1751_s19 = smov 88   ;;  %s1752_s21 = smov 80  }
  0x3f   : > { %v612_v2 = vmul.f32 5.656854, %v611_v1  ;;  %646 = vmatpush.bf16.msra.mxu0 %v1387_v0  ;;  %v1386_v4 = vld [vmem:[%s2191_s3] sm:$0xff]  ;;  %s1757_s30 = smov 40   ;;  %s1758_s29 = smov 56  }
  0x40   : > { %v1504_v7 = vld [vmem:[%s2192_s4] ss:$0 sm:$0xff]  ;;  %s1759_s15 = smov 48   ;;  %s1322_s9 = sshll.u32 %s1944_s27, 4 }
  0x41   : > { %v1967_v5 = vadd.f32 %v613_v3, %v612_v2  ;;  %s2195_s5 = sld [smem:[#allocation23_spill]] }
  0x43   : > { %v615_v6 = vpack.c.bf16 %v1967_v5, %v1967_v5  ;;  %647 = vmatpush.bf16.msra.mxu0 %v1386_v4 }
  0x46   : > { %1332 = vmatmul.msk.bf16.vlgmr.msra.gmra.mxu0 %vm636_vm0, %v615_v6 }
  0xc3   : > { %v649_v8 = vpop.f32.mrf.mxu0 }
  0xc4   : > { %v650_v9 = vadd.f32 %v1504_v7, %v649_v8 }
  0xc6   : > { %v653_v10 = vpack.c.bf16 %v650_v9, %v650_v9  ;;  %v654_v11 = vmul.f32 0.35355338, %v650_v9 }
  0xc8   : > { %v657_v12 = vpack.c.bf16 %v654_v11, %v654_v11  ;;  %v659_v13 = vunpack.c.l.b16 %v653_v10 }
  0xca   : > { %v1975_v14 = vpack.c.b16 %v659_v13, %v659_v13  ;;  %v726_v15 = vunpack.c.l.b16 %v657_v12 }
  0xcb   : > { %v651_v16 = vpop.f32.mrf.mxu0 }
  0xcc   : > { %661 = vrot.lane.b32.xlu0 %v1975_v14, %s1748_s13  ;;  %v727_v17 = vpack.c.b16 %v726_v15, %v726_v15  ;;  %s2019_s13 = scalar_lea.vmem [#allocation10], %s1322_s9 }
  0xce   : > { %860 = vrot.lane.b32.xlu2 %v727_v17, %s1749_s16  ;;  %728 = vrot.lane.b32.xlu1 %v727_v17, %s1750_s20  ;;  %s1760_s16 = smov 8   ;;  %s1761_s20 = smov 16  }
  0xd4   : > { %730 = vrot.lane.b32.xlu0 %v1975_v14, %s1751_s19  ;;  %s1762_s19 = smov 24  }
  0xd6   : > { %796 = vrot.lane.b32.xlu2 %v1975_v14, %s1752_s21  ;;  %862 = vrot.lane.b32.xlu1 %v1975_v14, %s1753_s14 }
  0xdc   : > { %794 = vrot.lane.b32.xlu0 %v727_v17, %s1754_s28  ;;  %s1396_s28 = sshll.u32 %s1734_s24, 4 }
 0x128   : > { %v861_v18 = vpop.permute.xlu2 %860 }
 0x130   : > { %v797_v19 = vpop.permute.xlu2 %796 }
 0x131   : > { %v802_v20 = vsel %vm663_vm1, %v797_v19, 0 }
 0x132   : > { %811 = vmatpush.bf16.xpose.msrb.mxu0 %v802_v20 }
 0x13e   : > { %v662_v21 = vpop.permute.xlu0 %661 }
 0x13f   : > { %v668_v22 = vsel %vm663_vm1, %v662_v21, 0 }
 0x140   : > { %v729_v23 = vpop.permute.xlu1 %728  ;;  %677 = vmatpush.bf16.xpose.msra.mxu1 %v668_v22 }
 0x146   : > { %v731_v24 = vpop.permute.xlu0 %730 }
 0x147   : > { %1333 = vmatmul.msk.bf16.vlgmr.msra.gmra.mxu1 %vm663_vm1, %v657_v12  ;;  %v736_v25 = vsel %vm663_vm1, %v731_v24, 0 }
 0x148   : > { %v863_v26 = vpop.permute.xlu1 %862  ;;  %745 = vmatpush.bf16.xpose.msra.mxu3 %v736_v25 }
 0x149   : > { %v868_v27 = vsel %vm663_vm1, %v863_v26, 0 }
 0x14e   : > { %v795_v28 = vpop.permute.xlu0 %794 }
 0x14f   : > { %1335 = vmatmul.msk.bf16.vlgmr.msra.gmra.mxu3 %vm663_vm1, %v729_v23  ;;  %1338 = vmatmul.msk.bf16.vlgmr.msrb.gmra.mxu0 %vm663_vm1, %v795_v28 }
 0x150   : > { %877 = vmatpush.bf16.xpose.msrb.mxu3 %v868_v27 }
 0x15f   : > { %1341 = vmatmul.msk.bf16.vlgmr.msrb.gmra.mxu3 %vm663_vm1, %v861_v18 }
 0x1c4   : > { %v679_v34 = vpop.f32.mrf.mxu1 }
 0x1c5   : > { %v686_v35 = vsel %vm1991_vm3, -1e+10, %v679_v34 }
 0x1c6   : > { %v687_v36 = vsel %vm663_vm1, %v686_v35, -inf }
 0x1c7   : > { %688 = vmax.xlane.f32.xlu1 %v687_v36 }
 0x1cc   : > { %v681_v37 = vpop.f32.mrf.mxu1  ;;  %v813_v38 = vpop.f32.mrf.mxu0 }
 0x1cd   : > { %v817_v43 = vsel %vm1991_vm3, -1e+10, %v813_v38 }
 0x1ce   : > { %v818_v45 = vsel %vm663_vm1, %v817_v43, -inf }
 0x1d2   : > { %v747_v39 = vpop.f32.mrf.mxu3 }
 0x1d3   : > { %v751_v40 = vsel %vm1991_vm3, -1e+10, %v747_v39 }
 0x1d4   : > { %v815_v41 = vpop.f32.mrf.mxu0  ;;  %v752_v42 = vsel %vm663_vm1, %v751_v40, -inf }
 0x1d5   : > { %753 = vmax.xlane.f32.xlu2 %v752_v42 }
 0x1da   : > { %v749_v44 = vpop.f32.mrf.mxu3 }
 0x1db   : > { %v1388_v44 = vld [vmem:[%s2195_s5] sm:$0xff] }
 0x1dd   : > { %819 = vmax.xlane.f32.xlu2 %v818_v45 }
 0x1e2   : > { %v879_v46 = vpop.f32.mrf.mxu3 }
 0x1e3   : > { %v883_v47 = vsel %vm1991_vm3, -1e+10, %v879_v46 }
 0x1e4   : > { %v884_v48 = vsel %vm663_vm1, %v883_v47, -inf }
 0x1e5   : > { %885 = vmax.xlane.f32.xlu0 %v884_v48 }
 0x1ea   : > { %v881_v49 = vpop.f32.mrf.mxu3 }
 0x1eb   : > { %v1505_v49 = vld [vmem:[%s2151_s6] ss:$0 sm:$0xff] }
 0x1f5   : > { %701 = vrot.lane.b32.xlu2 %v1975_v14, %s2167_s17 }
 0x1fd   : > { %898 = vrot.lane.b32.xlu2 %v1975_v14, %s1757_s30 }
 0x23a   : > { %v689_v50 = vpop.xlane.xlu1 %688 }
 0x23b   : > { %v690_v51 = vsub.f32 %v686_v35, %v689_v50 }
 0x23d   : > { %v691_v52 = vmul.f32 1.442695, %v690_v51 }
 0x23f   : > { %1512 = vpow2.f32 %v691_v52 }
 0x245   : > { %v1513_v53 = vpop.eup %1512 }
 0x246   : > { %v693_v54 = vsel %vm663_vm1, %v1513_v53, 0.0 }
 0x247   : > { %694 = vadd.xlane.f32.xlu1 %v693_v54 }
 0x248   : > { %v754_v55 = vpop.xlane.xlu2 %753 }
 0x249   : > { %v755_v58 = vsub.f32 %v751_v40, %v754_v55  ;;  %v1763_v55 = vmov 32.0  }
 0x24b   : > { %v756_v60 = vmul.f32 1.442695, %v755_v58 }
 0x250   : > { %v820_v56 = vpop.xlane.xlu2 %819 }
 0x251   : > { %v821_v57 = vsub.f32 %v817_v43, %v820_v56  ;;  %v1389_v43 = vld [vmem:[%s2195_s5 + $0x8] sm:$0xff] }
 0x252   : > { %956 = vmatpush.bf16.msra.mxu0 %v1389_v43 }
 0x253   : > { %v822_v59 = vmul.f32 1.442695, %v821_v57 }
 0x255   : > { %1514 = vpow2.f32 %v822_v59 }
 0x256   : > { %1516 = vpow2.f32 %v756_v60  ;;  %957 = vmatpush.bf16.msra.mxu0 %v1388_v44 }
 0x258   : > { %v702_v61 = vpop.permute.xlu2 %701  ;;  %v886_v62 = vpop.xlane.xlu0 %885 }
 0x259   : > { %v708_v63 = vsel %vm706_vm4, %v702_v61, 0  ;;  %v887_v1 = vsub.f32 %v883_v47, %v886_v62 }
 0x25a   : > { %717 = vmatpush.bf16.msra.mxu2 %v708_v63 }
 0x25b   : > { %v1515_v0 = vpop.eup %1514  ;;  %v888_v3 = vmul.f32 1.442695, %v887_v1 }
 0x25c   : > { %v824_v2 = vsel %vm663_vm1, %v1515_v0, 0.0  ;;  %v1517_v4 = vpop.eup %1516 }
 0x25d   : > { %825 = vadd.xlane.f32.xlu0 %v824_v2  ;;  %1518 = vpow2.f32 %v888_v3  ;;  %v758_v6 = vsel %vm663_vm1, %v1517_v4, 0.0  ;;  %v1391_v2 = vld [vmem:[#allocation8 + $0x8] sm:$0xff]  ;;  %v1390_v3 = vld [vmem:[#allocation8] sm:$0xff] }
 0x260   : > { %766 = vrot.lane.b32.xlu1 %v1975_v14, %s1758_s29  ;;  %v899_v15 = vpop.permute.xlu2 %898 }
 0x261   : > { %v904_v17 = vsel %vm706_vm4, %v899_v15, 0 }
 0x263   : > { %v1519_v7 = vpop.eup %1518 }
 0x264   : > { %v890_v8 = vsel %vm663_vm1, %v1519_v7, 0.0 }
 0x265   : > { %759 = vadd.xlane.f32.xlu0 %v758_v6 }
 0x26d   : > { %891 = vadd.xlane.f32.xlu0 %v890_v8  ;;  %v1394_v8 = vld [vmem:[%s2156_s11 + $0x10] sm:$0xff] }
 0x281   : > { %832 = vrot.lane.b32.xlu0 %v1975_v14, %s1759_s15  ;;  %s2196_s15 = sld [smem:[#allocation28_spill]] }
 0x287   : > { %s1164_s9 = scalar_lea.hbm %s2196_s15, %s1396_s28  ;;  %s1644_s3 = scalar_lea.hbm %s2196_s15, 32 }
 0x2ba   : > { %v695_v9 = vpop.xlane.xlu1 %694 }
 0x2bb   : > { %1520 = vrcp.f32 %v695_v9 }
 0x2c1   : > { %v1521_v10 = vpop.eup %1520 }
 0x2c2   : > { %v697_v11 = vmul.f32 %v1521_v10, %v1513_v53  ;;  %v1393_v10 = vld [vmem:[%s2156_s11 + $0x8] sm:$0xff] }
 0x2c4   : > { %v698_v12 = vpack.c.bf16 %v697_v11, %v697_v11 }
 0x2c6   : > { %1334 = vmatmul.msk.bf16.vlgmr.msra.gmra.mxu2 %vm663_vm1, %v698_v12  ;;  %700 = vst.msk [vmem:[%s2019_s13] sm:$0xf] %vm699_vm5, %v698_v12 }
 0x2d0   : > { %v826_v13 = vpop.xlane.xlu0 %825 }
 0x2d1   : > { %1522 = vrcp.f32 %v826_v13 }
 0x2d2   : > { %v767_v16 = vpop.permute.xlu1 %766 }
 0x2d3   : > { %v772_v14 = vsel %vm706_vm4, %v767_v16, 0 }
 0x2d4   : > { %781 = vmatpush.bf16.msrb.mxu2 %v772_v14 }
 0x2d7   : > { %v1523_v18 = vpop.eup %1522 }
 0x2d8   : > { %913 = vmatpush.bf16.msra.mxu2 %v904_v17  ;;  %v828_v19 = vmul.f32 %v1523_v18, %v1515_v0  ;;  %v760_v20 = vpop.xlane.xlu0 %759  ;;  %v1506_v17 = vld [vmem:[%s2152_s7] ss:$0 sm:$0xff] }
 0x2d9   : > { %1524 = vrcp.f32 %v760_v20 }
 0x2da   : > { %v829_v21 = vpack.c.bf16 %v828_v19, %v828_v19  ;;  %v1507_v19 = vld [vmem:[%s2153_s8] ss:$0 sm:$0xff] }
 0x2dc   : > { %1339 = vst.msk [vmem:[%s2019_s13 + $0x8] sm:$0xf] %vm699_vm5, %v829_v21 }
 0x2df   : > { %v1525_v22 = vpop.eup %1524 }
 0x2e0   : > { %v762_v23 = vmul.f32 %v1525_v22, %v1517_v4  ;;  %v892_v24 = vpop.xlane.xlu0 %891  ;;  %v1395_v4 = vld [vmem:[%s2156_s11 + $0x18] sm:$0xff] }
 0x2e1   : > { %1526 = vrcp.f32 %v892_v24  ;;  %1086 = vmatpush.bf16.msra.mxu3 %v1395_v4  ;;  %v1392_v24 = vld [vmem:[%s2156_s11] sm:$0xff] }
 0x2e2   : > { %v763_v25 = vpack.c.bf16 %v762_v23, %v762_v23  ;;  %1528 = vrcp.f32 %v1763_v55 }
 0x2e4   : > { %1337 = vmatmul.msk.bf16.vlgmr.msrb.gmra.mxu2 %vm663_vm1, %v763_v25  ;;  %1336 = vst.msk [vmem:[%s2019_s13 + $0x4] sm:$0xf] %vm699_vm5, %v763_v25  ;;  %v1508_v25 = vld [vmem:[%s2155_s10] ss:$0 sm:$0xff] }
 0x2e5   : > { %1087 = vmatpush.bf16.msra.mxu3 %v1394_v8 }
 0x2e7   : > { %v1527_v26 = vpop.eup %1526 }
 0x2e8   : > { %v894_v27 = vmul.f32 %v1527_v26, %v1519_v7  ;;  %v1529_v56 = vpop.eup %1528 }
 0x2e9   : > { %v970_v57 = vmul.f32 32.0, %v1529_v56  ;;  %vm974_vm9 = vweird.f32 %v1529_v56  ;;  %1088 = vmatpush.bf16.msra.mxu3 %v1393_v10 }
 0x2ea   : > { %v895_v28 = vpack.c.bf16 %v894_v27, %v894_v27 }
 0x2eb   : > { %v971_v58 = vsub.f32 1.0, %v970_v57 }
 0x2ec   : > { %1342 = vst.msk [vmem:[%s2019_s13 + $0xc] sm:$0xf] %vm699_vm5, %v895_v28 }
 0x2ed   : > { %v972_v59 = vmul.f32 %v1529_v56, %v971_v58  ;;  %1089 = vmatpush.bf16.msra.mxu3 %v1392_v24 }
 0x2ef   : > { %v973_v60 = vadd.f32 %v1529_v56, %v972_v59 }
 0x2f1   : > { %v2048_v61 = vsel %vm974_vm9, %v1529_v56, %v973_v60 }
 0x2f3   : > { %v833_v29 = vpop.permute.xlu0 %832 }
 0x2f4   : > { %1343 = vmatmul.msk.bf16.vlgmr.msra.gmra.mxu2 %vm663_vm1, %v895_v28  ;;  %v838_v30 = vsel %vm706_vm4, %v833_v29, 0 }
 0x2f5   : > { %847 = vmatpush.bf16.msrb.mxu1 %v838_v30 }
 0x2f8   : > { %1340 = vmatmul.msk.bf16.vlgmr.msrb.gmra.mxu1 %vm663_vm1, %v829_v21 }
 0x2f9   : > { %1033 = vmatpush.bf16.msra.mxu1 %v1391_v2 }
 0x2fd   : > { %1034 = vmatpush.bf16.msra.mxu1 %v1390_v3 }
 0x349   : > { %v719_v31 = vpop.f32.mrf.mxu2 }
 0x34a   : > { %v723_v32 = vpack.c.bf16 %v719_v31, %v719_v31  ;;  %v1509_v31 = vld [vmem:[%s2157_s12] ss:$0 sm:$0xff] }
 0x34c   : > { %724 = vst.msk [vmem:[#allocation2] sm:$0xf] %vm699_vm5, %v723_v32 }
 0x351   : > { %v721_v33 = vpop.f32.mrf.mxu2 }
 0x367   : > { %v783_v34 = vpop.f32.mrf.mxu2 }
 0x368   : > { %v787_v35 = vpack.c.bf16 %v783_v34, %v783_v34 }
 0x36a   : > { %789 = vrot.lane.b32.xlu1 %v787_v35, %s1760_s16  ;;  %s1165_s16 = sshll.u32 %s2019_s13, 4  ;;  %s1166_s16 = int_to_ptr.vmem [resolvable:$true] %s1165_s16 }
 0x36f   : > { %v785_v36 = vpop.f32.mrf.mxu2 }
 0x375   : > { %v849_v37 = vpop.f32.mrf.mxu1 }
 0x376   : > { %v853_v38 = vpack.c.bf16 %v849_v37, %v849_v37 }
 0x377   : > { %v915_v39 = vpop.f32.mrf.mxu2 }
 0x378   : > { %v919_v40 = vpack.c.bf16 %v915_v39, %v915_v39  ;;  %855 = vrot.lane.b32.xlu2 %v853_v38, %s1761_s20  ;;  %s1167_s20 = sshll.u32 %s1164_s9, 4  ;;  %s1168_s20 = int_to_ptr.hbm [resolvable:$true] %s1167_s20 }
 0x379   : > { %s1638_s21 = sshra.s32 %s1168_s20, 4  ;;  %s1639_s21 = int_to_ptr.hbm [resolvable:$true] %s1638_s21 }
 0x37a   : > { %921 = vrot.lane.b32.xlu1 %v919_v40, %s1762_s19  ;;  %s1137_s19 = scalar_lea.sflag [#allocation11], %s1944_s27  ;;  %s1640_s14 = scalar_lea.hbm %s1639_s21, 16 }
 0x37b   : > { %p1641_p1 = scmp.ne.s32.totalorder %s1639_s21, %s1640_s14  ;;  %p1645_p12 = scmp.lt.s32.totalorder %s1639_s21, %s2196_s15 }
 0x37c   : > { %p1646_p13 = scmp.lt.s32.totalorder %s1644_s3, %s1640_s14 }
 0x37d   : > { %v851_v41 = vpop.f32.mrf.mxu1  ;;  %p1642_p3 = pnand %p1641_p1, %p1926_p2 }
 0x37e   : > { %p1647_p0 = por %p1646_p13, %p1645_p12 }
 0x37f   : > { %v917_v42 = vpop.f32.mrf.mxu2  ;;  %p1643_p11 = pneg %p1642_p3 }
 0x381   : > { %p1648_p4 = pnand %p1647_p0, %p1643_p11 }
 0x3d2   : > { %v856_v46 = vpop.permute.xlu2 %855 }
 0x3dc   : > { %v790_v45 = vpop.permute.xlu1 %789 }
 0x3dd   : > { %793 = vst.msk [vmem:[#allocation2] sm:$0xf] %vm792_vm6, %v790_v45 }
 0x3de   : > { %859 = vst.msk [vmem:[#allocation2] sm:$0xf] %vm858_vm7, %v856_v46 }
 0x3ec   : > { %v922_v47 = vpop.permute.xlu1 %921 }
 0x3ed   : > { %925 = vst.msk [vmem:[#allocation2] sm:$0xf] %vm924_vm8, %v922_v47 }
 0x3f4   : > { %v926_v48 = vld [vmem:[#allocation2] sm:$0xf] }
 0x3f5   : > { %1352 = vmatmul.msk.bf16.vlgmr.msra.gmra.mxu0 %vm636_vm0, %v926_v48 }
 0x472   : > { %v959_v50 = vpop.f32.mrf.mxu0 }
 0x473   : > { %v960_v51 = vadd.f32 %v1505_v49, %v959_v50 }
 0x475   : > { %v963_v52 = vadd.f32 %v960_v51, %v1967_v5 }
 0x477   : > { %v966_v53 = vsel %vm636_vm0, %v963_v52, 0.0 }
 0x478   : > { %967 = vadd.xlane.f32.xlu2 %v966_v53 }
 0x47a   : > { %v961_v54 = vpop.f32.mrf.mxu0 }
 0x4eb   : > { %v968_v62 = vpop.xlane.xlu2 %967 }
 0x4ec   : > { %v976_v63 = vmul.f32 %v2048_v61, %v968_v62 }
 0x4ee   : > { %v977_v0 = vsub.f32 %v963_v52, %v976_v63 }
 0x4f0   : > { %v978_v1 = vmul.f32 %v977_v0, %v977_v0 }
 0x4f2   : > { %v979_v5 = vsel %vm636_vm0, %v978_v1, 0.0 }
 0x4f3   : > { %980 = vadd.xlane.f32.xlu1 %v979_v5 }
 0x566   : > { %v981_v6 = vpop.xlane.xlu1 %980 }
 0x567   : > { %v982_v7 = vmul.f32 %v981_v6, %v2048_v61 }
 0x569   : > { %v983_v9 = vadd.f32 1e-05, %v982_v7 }
 0x56b   : > { %1530 = vrsqrt.f32 %v983_v9  ;;  %vm990_vm11 = vweird.f32 %v983_v9 }
 0x571   : > { %v1531_v11 = vpop.eup %1530 }
 0x572   : > { %v985_v12 = vmul.f32 %v1531_v11, %v983_v9  ;;  %vm991_vm10 = vweird.f32 %v1531_v11 }
 0x573   : > { %vm992_vm12 = vmor %vm990_vm11, %vm991_vm10 }
 0x574   : > { %v986_v13 = vmul.f32 %v1531_v11, %v985_v12 }
 0x576   : > { %v987_v15 = vmul.f32 0.5, %v986_v13 }
 0x578   : > { %v988_v16 = vsub.f32 1.5, %v987_v15 }
 0x57a   : > { %v989_v14 = vmul.f32 %v1531_v11, %v988_v16 }
 0x57c   : > { %v993_v18 = vsel %vm992_vm12, %v1531_v11, %v989_v14 }
 0x57d   : > { %v994_v20 = vmul.f32 %v993_v18, %v977_v0 }
 0x57f   : > { %v998_v21 = vmul.f32 %v1506_v17, %v994_v20 }
 0x581   : > { %v1002_v22 = vadd.f32 %v1507_v19, %v998_v21 }
 0x583   : > { %v1003_v23 = vpack.c.bf16 %v1002_v22, %v1002_v22 }
 0x585   : > { %1361 = vmatmul.msk.bf16.vlgmr.msra.gmra.mxu1 %vm636_vm0, %v1003_v23 }
 0x602   : > { %v1036_v26 = vpop.f32.mrf.mxu1 }
 0x603   : > { %v1037_v27 = vadd.f32 %v1508_v25, %v1036_v26 }
 0x605   : > { %v1040_v28 = vmax.f32 %v1037_v27, 0.0 }
 0x607   : > { %v1041_v29 = vpack.c.bf16 %v1040_v28, %v1040_v28 }
 0x609   : > { %1378 = vmatmul.msk.bf16.vlgmr.msra.gmra.mxu3 %vm1078_vm13, %v1041_v29 }
 0x60a   : > { %v1038_v30 = vpop.f32.mrf.mxu1 }
 0x68c   : > { %v1091_v32 = vpop.f32.mrf.mxu3 }
 0x68d   : > { %v1092_v33 = vadd.f32 %v1509_v31, %v1091_v32 }
 0x68f   : > { %v1095_v34 = vadd.f32 %v1092_v33, %v1002_v22 }
 0x691   : > { %v1098_v35 = vsel %vm636_vm0, %v1095_v34, 0.0 }
 0x692   : > { %1099 = vadd.xlane.f32.xlu0 %v1098_v35 }
 0x694   : > { %v1093_v36 = vpop.f32.mrf.mxu3 }
 0x705   : > { %v1100_v37 = vpop.xlane.xlu0 %1099 }
 0x706   : > { %v1101_v38 = vmul.f32 %v1100_v37, %v2048_v61 }
 0x708   : > { %v1102_v39 = vsub.f32 %v1095_v34, %v1101_v38 }
 0x70a   : > { %v1103_v40 = vmul.f32 %v1102_v39, %v1102_v39 }
 0x70c   : > { %v1104_v41 = vsel %vm636_vm0, %v1103_v40, 0.0 }
 0x70d   : > { %1105 = vadd.xlane.f32.xlu2 %v1104_v41 }
 0x70e   : > { %1651 = shalt.err (!%p1648_p4)
}
 0x70f   : > { %s1764_s13 = smov 4   ;;  %s2197_s28 = smov 64   ;;  %vm1129_vm1 = vcmask 257024  }
 0x710   : > { %1408 = dma.vmem_to_hbm [thread:$0]  (%p1926_p2), %s1166_s16, 256, %s1168_s20, %s1137_s19, %s2197_s28, %s2197_s28, %s1764_s13  }
 0x711   : > { %s1321_s1 = sshll.u32 %s1944_s27, 2  ;;  %s1381_s3 = sshll.u32 %s1734_s24, 2 }
 0x712   : > { %s2198_s17 = sld [smem:[#allocation25_spill]]  ;;  %s598_s14 = scalar_lea.vmem [#allocation9], %s1321_s1 }
 0x713   : > { %s2199_s9 = sld [smem:[#allocation26_spill]]  ;;  %s1150_s24 = sshll.u32 %s598_s14, 4  ;;  %s1151_s24 = int_to_ptr.vmem [resolvable:$true] %s1150_s24 }
 0x714   : > { %s2200_s19 = sld [smem:[#allocation27_spill]]  ;;  %s1132_s28 = scalar_lea.sflag [#allocation5], %s1944_s27 }
 0x718   : > { %v1510_v51 = vld [vmem:[%s2198_s17] ss:$0 sm:$0xff] }
 0x719   : > { %v1511_v53 = vld [vmem:[%s2199_s9] ss:$0 sm:$0xff] }
 0x71a   : > { %s1148_s21 = scalar_lea.hbm %s2200_s19, %s1381_s3  ;;  %s1672_s1 = scalar_lea.hbm %s2200_s19, 8 }
 0x71b   : > { %s1152_s13 = sshll.u32 %s1148_s21, 4  ;;  %s1153_s13 = int_to_ptr.hbm [resolvable:$true] %s1152_s13 }
 0x71c   : > { %s1666_s4 = sshra.s32 %s1153_s13, 4  ;;  %s1667_s4 = int_to_ptr.hbm [resolvable:$true] %s1666_s4 }
 0x71d   : > { %s1668_s5 = scalar_lea.hbm %s1667_s4, 4  ;;  %p1673_p7 = scmp.lt.s32.totalorder %s1667_s4, %s2200_s19 }
 0x71e   : > { %p1669_p6 = scmp.ne.s32.totalorder %s1667_s4, %s1668_s5  ;;  %p1674_p1 = scmp.lt.s32.totalorder %s1672_s1, %s1668_s5 }
 0x720   : > { %p1670_p9 = pnand %p1669_p6, %p1926_p2  ;;  %p1675_p3 = por %p1674_p1, %p1673_p7 }
 0x722   : > { %p1671_p10 = pneg %p1670_p9 }
 0x724   : > { %p1676_p11 = pnand %p1675_p3, %p1671_p10 }
 0x780   : > { %v1106_v42 = vpop.xlane.xlu2 %1105 }
 0x781   : > { %v1107_v43 = vmul.f32 %v1106_v42, %v2048_v61 }
 0x783   : > { %v1108_v44 = vadd.f32 1e-05, %v1107_v43 }
 0x785   : > { %1532 = vrsqrt.f32 %v1108_v44  ;;  %vm1115_vm15 = vweird.f32 %v1108_v44 }
 0x78b   : > { %v1533_v45 = vpop.eup %1532 }
 0x78c   : > { %v1110_v46 = vmul.f32 %v1533_v45, %v1108_v44  ;;  %vm1116_vm14 = vweird.f32 %v1533_v45 }
 0x78d   : > { %vm1117_vm0 = vmor %vm1115_vm15, %vm1116_vm14 }
 0x78e   : > { %v1111_v47 = vmul.f32 %v1533_v45, %v1110_v46 }
 0x790   : > { %v1112_v48 = vmul.f32 0.5, %v1111_v47 }
 0x792   : > { %v1113_v49 = vsub.f32 1.5, %v1112_v48 }
 0x794   : > { %v1114_v50 = vmul.f32 %v1533_v45, %v1113_v49 }
 0x796   : > { %v1118_v52 = vsel %vm1117_vm0, %v1533_v45, %v1114_v50 }
 0x797   : > { %v1119_v54 = vmul.f32 %v1118_v52, %v1102_v39 }
 0x799   : > { %v1123_v55 = vmul.f32 %v1510_v51, %v1119_v54 }
 0x79b   : > { %v1127_v56 = vadd.f32 %v1511_v53, %v1123_v55 }
 0x79d   : > { %v1128_v57 = vpack.c.bf16 %v1127_v56, %v1127_v56 }
 0x79f   : > { %1130 = vst.msk [vmem:[%s598_s14] sm:$0xf] %vm1129_vm1, %v1128_v57 }
 0x7a0   : > { %1679 = shalt.err (!%p1676_p11)
}
 0x7a1   : > { %1407 = dma.vmem_to_hbm [thread:$0]  (%p1926_p2), %s1151_s24, 64, %s1153_s13, %s1132_s28  }
 0x7a2 PF: > { %s2201_s27 = sld [smem:[#allocation16_spill]]  ;;  %p1423_p12 = pnand %p1317_p8, %p1897_p5 }
 0x7a4   : > { %p1424_p13 = pneg %p1423_p12 }
 0x7a8   : > { %s1182_s16 = sand.u32 1, %s2201_s27  }
 0x7a9   : > { %s1183_s20 = scalar_lea.sflag [#allocation5], %s1182_s16 }
 0x7aa   : > { %1713 = dma.done.wait (%p1424_p13), %s1183_s20, 64  }
 0x7ab   : > { %1715 = vsyncadd (%p1424_p13), %s1183_s20, 4294967232  ;;  %s1193_s21 = scalar_lea.sflag [#allocation11], %s1182_s16 }
 0x7ac   : > { %1717 = dma.done.wait (%p1424_p13), %s1193_s21, 256  }
 0x7ad   : > { %1719 = vsyncadd (%p1424_p13), %s1193_s21, 4294967040  ;;  %s37_s26 = sadd.s32 1, %s1742_s26   ;;  %s2203_s21 = smov %s1726_s22 }
 0x7ae   : > { %p34_p0 = scmp.ge.s32.totalorder %s37_s26, 4   ;;  %s2204_s22 = smov %s1730_s23 }
 0x7af   : > { %s2205_s23 = smov %s1939_s18  ;;  %s2206_s24 = smov %s1738_s25 }
 0x7b0   : > { %s2207_s25 = smov %s2209_s0  ;;  %36 = sbr.rel (!%p34_p0) target bundleno = 21 (0x15), region = 156 }
 0x7b5   :  { %1199 = vsyncpa [#allocation4], 1 }
 0x7b6   :  { %1201 = vsyncpa [#allocation4 + $0x1], 1 }
 0x7b7   :  { %1202 = vsyncpa [#allocation7], 1 }
 0x7b8   :  { %1203 = vsyncpa [#allocation5], 1 }
 0x7b9   :  { %1205 = vsyncpa [#allocation5 + $0x1], 1 }
 0x7ba   :  { %1206 = vsyncpa [#allocation11], 1 }
 0x7bb   :  { %1208 = vsyncpa [#allocation11 + $0x1], 1 }

</bundles_post_ra>
